<compile_context>
chip_gen: v7x
topology: tpu7x:2x2x1
jax: 0.10.0
libtpu: 0.0.40
codegen_flags: <defaults>
</compile_context>

<pallas_src>
import functools

import jax
import jax.numpy as jnp
from jax import lax
from jax.experimental import pallas as pl
from jax.experimental.pallas import tpu as pltpu


# For output row oh = 2*i + py (stride=2, pad=1, K=4): oh = 2*ih - 1 + kh, so each phase py
# uses two (padded-row-offset ro, kernel-row kh) taps; same for columns with px.
_ROW_TAPS = {0: {0: 3, 1: 1},   # py=0: (ro=0 -> kh=3), (ro=1 -> kh=1)
             1: {1: 2, 2: 0}}   # py=1: (ro=1 -> kh=2), (ro=2 -> kh=0)


def pack_upsample_params(weight, bias):
    """Pack ConvTranspose2d params for the fused per-tap matmuls.  Call ONCE at init.

    weight: (C_in, C_out, 4, 4) torch layout -> (9, C_in, 4*C_out): per tap t = 3*ro + co,
            the 4 output phases p = 2*py + px are stacked along the lane axis (zeros where
            a tap is unused by a phase).
    bias:   (C_out,) -> (1, 4*C_out) tiled per phase.
    """
    C_in, C_out = weight.shape[0], weight.shape[1]
    wf = jnp.asarray(weight, jnp.float32)
    taps = []
    for ro in range(3):
        for co in range(3):
            cols = []
            for py in (0, 1):
                for px in (0, 1):
                    kh = _ROW_TAPS[py].get(ro)
                    kw = _ROW_TAPS[px].get(co)
                    if kh is None or kw is None:
                        cols.append(jnp.zeros((C_in, C_out), jnp.float32))
                    else:
                        cols.append(wf[:, :, kh, kw])
            taps.append(jnp.concatenate(cols, axis=1))        # (C_in, 4*C_out)
    w_packed = jnp.stack(taps, axis=0)                        # (9, C_in, 4*C_out)
    b_packed = jnp.tile(jnp.asarray(bias, jnp.float32), 4).reshape(1, 4 * C_out)
    return w_packed, b_packed


def _upsample_kernel(x_body, x_top, x_bot, w_ref, b_ref, out_ref, xpad):
    # x_body : (1, BH, W, C_in)   current row block (BlockSpec auto-pipelined)
    # x_top  : (1, 1, W, C_in)    row above the block (clamped fetch; zeroed when h == 0)
    # x_bot  : (1, 1, W, C_in)    row below the block (clamped fetch; zeroed when h == last)
    # w_ref  : (9, C_in, 4*C_out) per-tap weights, all 4 output phases lane-stacked
    # b_ref  : (1, 4*C_out)       packed bias
    # out_ref: (1, BH*W, 4*C_out) lane-dense phase-stacked output block
    # xpad   : VMEM scratch (BH+2, W+2, C_in) — zero-padded block assembled in VMEM
    h = pl.program_id(1)
    n_hb = pl.num_programs(1)
    _, BH, W, C_in = x_body.shape
    C4 = w_ref.shape[2]

    top_valid = (h > 0).astype(jnp.float32)
    bot_valid = (h < n_hb - 1).astype(jnp.float32)

    # Assemble the zero-padded input block (cheap VPU stores; hide under DMA/MXU).
    xpad[:, 0, :] = jnp.zeros((BH + 2, C_in), jnp.float32)
    xpad[:, W + 1, :] = jnp.zeros((BH + 2, C_in), jnp.float32)
    xpad[0, 1:W + 1, :] = x_top[0, 0].astype(jnp.float32) * top_valid
    xpad[BH + 1, 1:W + 1, :] = x_bot[0, 0].astype(jnp.float32) * bot_valid
    xpad[1:BH + 1, 1:W + 1, :] = x_body[0].astype(jnp.float32)

    # 9 accumulated per-tap MXU matmuls; each tap weight is (C_in, 4*C_out) with zeros in
    # the phase columns that do not use that tap.  (For C_in % 128 == 0 a single fused
    # (BH*W, 9*C_in) x (9*C_in, 4*C_out) slab matmul is the better alternative.)
    acc = jnp.zeros((BH * W, C4), jnp.float32)
    for ro in range(3):
        for co in range(3):
            xs = xpad[ro:ro + BH, co:co + W, :].reshape(BH * W, C_in)
            acc = acc + jnp.dot(xs, w_ref[3 * ro + co],
                                preferred_element_type=jnp.float32)
    y = acc + b_ref[...]

    # ELU (alpha = 1): x if x > 0 else exp(x) - 1   (exp(min(y,0)) guards overflow)
    y = jnp.where(y > 0.0, y, jnp.exp(jnp.minimum(y, 0.0)) - 1.0)

    out_ref[0] = y.astype(out_ref.dtype)


def _round_up(x, m):
    return ((x + m - 1) // m) * m


def _vmem_capacity_bytes():
    """Per-TensorCore VMEM capacity (generation-aware: 64 MiB on v7x, 128 MiB v5e/v6e)."""
    try:
        return int(pltpu.get_tpu_info().vmem_capacity_bytes)
    except Exception:
        return 64 << 20          # conservative fallback that fits every generation


def _vmem_footprint_bytes(BH, W, C_in, C_out):
    """Real padded VMEM footprint: lane dim rounds to 128, sublane dim to 8."""
    f32 = 4
    lane_ci = _round_up(C_in, 128)
    lane_c4 = _round_up(4 * C_out, 128)
    sub_w = _round_up(W, 8)
    body = 2 * BH * sub_w * lane_ci * f32                       # double-buffered body
    halo = 2 * 2 * sub_w * lane_ci * f32                        # top + bottom halo rows
    wgt = 2 * 9 * _round_up(C_in, 8) * lane_c4 * f32            # packed weights
    bias = 2 * 8 * lane_c4 * f32
    outb = 2 * _round_up(BH * W, 8) * lane_c4 * f32             # double-buffered output
    xpad = (BH + 2) * _round_up(W + 2, 8) * lane_ci * f32       # scratch assembly buffer
    tmps = (2 * _round_up(BH * W, 8) * lane_ci                  # per-tap slab
            + 3 * _round_up(BH * W, 8) * lane_c4) * f32         # accumulator / activation
    return body + halo + wgt + bias + outb + xpad + tmps


def _pick_h_block(H, W, C_in, C_out, budget):
    """Largest row block (divisor of H, sublane-aligned output) fitting the VMEM budget."""
    for bh in range(H, 0, -1):
        if H % bh:
            continue
        if (bh * W) % 8 != 0 and bh != H:
            continue
        if _vmem_footprint_bytes(bh, W, C_in, C_out) <= budget:
            return bh
    for bh in range(1, H + 1):                                  # nothing fits: smallest valid
        if H % bh == 0 and ((bh * W) % 8 == 0 or bh == H):
            return bh
    return H


def upsample_forward_packed(x_nchw, w_packed, b_packed, *, h_block=None):
    """ConvTranspose2d(C_in, C_out, 4, stride=2, padding=1) + ELU with pre-packed params.

    x_nchw  : (N, C_in, H, W) float32
    w_packed: (9, C_in, 4*C_out) float32   (from pack_upsample_params)
    b_packed: (1, 4*C_out) float32
    returns : (N, C_out, 2H, 2W) float32
    """
    N, C_in, H, W = x_nchw.shape
    C4 = w_packed.shape[2]
    C_out = C4 // 4
    assert w_packed.shape == (9, C_in, C4)

    vmem_cap = _vmem_capacity_bytes()
    if h_block is None:
        h_block = _pick_h_block(H, W, C_in, C_out, budget=vmem_cap // 2)
    BH = int(h_block)
    assert H % BH == 0, "h_block must divide H"
    assert (BH * W) % 8 == 0 or BH == H, "row block must give a sublane-aligned output tile"
    n_hb = H // BH

    est = _vmem_footprint_bytes(BH, W, C_in, C_out)
    vmem_limit = int(min(max(est + (4 << 20), 32 << 20), (vmem_cap * 3) // 4))

    # TODO(synk): if the producer/consumer can use NHWC directly, this input transpose and
    # the single epilogue transpose below disappear entirely (kernel is NHWC-native).
    x = jnp.transpose(x_nchw, (0, 2, 3, 1)).astype(jnp.float32)   # (N, H, W, C_in)

    # TODO(synk): for very small C_out (4*C_out < 128) a lane-denser output packing
    # (folding a W chunk into the lane axis) would avoid masked vst's, mainly on v5e.
    out4 = pl.pallas_call(
        _upsample_kernel,
        out_shape=jax.ShapeDtypeStruct((N, H * W, C4), jnp.float32),
        grid=(N, n_hb),
        in_specs=[
            # body rows of the block
            pl.BlockSpec((1, BH, W, C_in), lambda n, h: (n, h, 0, 0)),
            # 1-row halos above/below; index clamped into range, data masked to zero
            # in-kernel at the image boundary (padding folded into the kernel).
            pl.BlockSpec((1, 1, W, C_in),
                         lambda n, h: (n, jnp.maximum(h * BH - 1, 0), 0, 0)),
            pl.BlockSpec((1, 1, W, C_in),
                         lambda n, h: (n, jnp.minimum(h * BH + BH, H - 1), 0, 0)),
            pl.BlockSpec((9, C_in, C4), lambda n, h: (0, 0, 0)),   # packed weights
            pl.BlockSpec((1, C4), lambda n, h: (0, 0)),            # packed bias
        ],
        out_specs=pl.BlockSpec((1, BH * W, C4), lambda n, h: (n, h, 0)),
        scratch_shapes=[pltpu.VMEM((BH + 2, W + 2, C_in), jnp.float32)],
        compiler_params=pltpu.CompilerParams(
            dimension_semantics=("parallel", "parallel"),
            vmem_limit_bytes=vmem_limit,
        ),
    )(x, x, x, w_packed, b_packed)

    # Merged epilogue: phase de-interleave + NHWC->NCHW as ONE transpose (one HBM pass).
    # out4[n, i*W + j, (2*py+px)*C_out + c] -> y[n, c, 2i+py, 2j+px]
    # TODO(synk): emitting NCHW (or NHWC) tiles directly from the kernel would remove this
    # last output-sized pass at the cost of an in-kernel de-interleave (XLU work).
    y = out4.reshape(N, H, W, 2, 2, C_out)
    y = y.transpose(0, 5, 1, 3, 2, 4).reshape(N, C_out, 2 * H, 2 * W)
    return y


def upsample_forward(x_nchw, weight, bias, *, h_block=None):
    """Convenience wrapper: packs params inline (prefer pack_upsample_params + packed fwd)."""
    w_packed, b_packed = pack_upsample_params(weight, bias)
    return upsample_forward_packed(x_nchw, w_packed, b_packed, h_block=h_block)


def _reference(x_nchw, weight, bias):
    # ConvTranspose2d == dilated conv with flipped kernel; then ELU.
    w_conv = jnp.flip(weight, (2, 3)).transpose(1, 0, 2, 3)     # (C_out, C_in, 4, 4)
    y = lax.conv_general_dilated(
        x_nchw, w_conv,
        window_strides=(1, 1),
        padding=[(2, 2), (2, 2)],
        lhs_dilation=(2, 2),
        dimension_numbers=("NCHW", "OIHW", "NCHW"),
    ) + bias[None, :, None, None]
    return jax.nn.elu(y)


if __name__ == "__main__":
    N, C_in, C_out, H, W = 2, 4, 8, 16, 16

    key = jax.random.PRNGKey(0)
    kx, kw, kb = jax.random.split(key, 3)
    x = jax.random.normal(kx, (N, C_in, H, W), jnp.float32)
    weight = jax.random.normal(kw, (C_in, C_out, 4, 4), jnp.float32) * 0.1
    bias = jax.random.normal(kb, (C_out,), jnp.float32) * 0.1

    # Pack ConvTranspose params once, outside the jitted forward (perf-review item).
    w_packed, b_packed = pack_upsample_params(weight, bias)
    ref = _reference(x, weight, bias)

    # h_block=None exercises the auto (generation-aware) block picker; h_block=8 forces a
    # 2-block split per image so the row-halo fetch/masking path is also exercised.
    for hb in (None, 8):
        fwd = jax.jit(functools.partial(upsample_forward_packed, h_block=hb))
        out = fwd(x, w_packed, b_packed)
        jax.block_until_ready(out)
        assert out.shape == (N, C_out, 2 * H, 2 * W), out.shape
        max_err = float(jnp.max(jnp.abs(out - ref)))
        assert jnp.allclose(out, ref, atol=1e-4, rtol=1e-4), max_err

    print("KERNEL_OK")
</pallas_src>

<mosaic_0001>
module attributes {stable_mosaic.version = 11 : i64} {
  func.func @_upsample_kernel(%arg0: i32, %arg1: i32, %arg2: memref<1x16x16x4xf32, #tpu.memory_space<vmem>>, %arg3: memref<1x1x16x4xf32, #tpu.memory_space<vmem>>, %arg4: memref<1x1x16x4xf32, #tpu.memory_space<vmem>>, %arg5: memref<9x4x32xf32, #tpu.memory_space<vmem>>, %arg6: memref<1x32xf32, #tpu.memory_space<vmem>>, %arg7: memref<1x256x32xf32, #tpu.memory_space<vmem>>, %arg8: memref<18x18x4xf32, #tpu.memory_space<vmem>>) attributes {dimension_semantics = [#tpu.dimension_semantics<parallel>, #tpu.dimension_semantics<parallel>], iteration_bounds = array<i64: 2, 1>, scalar_prefetch = 0 : i64, scratch_operands = 1 : i64, tpu.core_type = #tpu.core_type<tc>, window_params = [{transform_indices = @transform_0, window_bounds = array<i64: 1, 16, 16, 4>}, {transform_indices = @transform_1, window_bounds = array<i64: 1, 1, 16, 4>}, {transform_indices = @transform_2, window_bounds = array<i64: 1, 1, 16, 4>}, {pipeline_mode = #tpu.pipeline_mode<synchronous>, transform_indices = @transform_3, window_bounds = array<i64: 9, 4, 32>}, {pipeline_mode = #tpu.pipeline_mode<synchronous>, transform_indices = @transform_4, window_bounds = array<i64: 1, 32>}, {transform_indices = @transform_5, window_bounds = array<i64: 1, 256, 32>}]} {
    %c0_i32 = arith.constant 0 : i32
    %0 = arith.cmpi sgt, %arg1, %c0_i32 : i32
    %1 = arith.extui %0 : i1 to i32
    %2 = arith.sitofp %1 : i32 to f32
    %c0_i32_0 = arith.constant 0 : i32
    %3 = arith.cmpi slt, %arg1, %c0_i32_0 : i32
    %4 = arith.extui %3 : i1 to i32
    %5 = arith.sitofp %4 : i32 to f32
    %cst = arith.constant 0.000000e+00 : f32
    %6 = vector.broadcast %cst : f32 to vector<18x4xf32>
    %c0 = arith.constant 0 : index
    %c0_1 = arith.constant 0 : index
    %c0_2 = arith.constant 0 : index
    %7 = vector.load %arg8[%c0, %c0_1, %c0_2] : memref<18x18x4xf32, #tpu.memory_space<vmem>>, vector<18x1x4xf32>
    %8 = vector.shape_cast %7 : vector<18x1x4xf32> to vector<18x4xf32>
    %9 = vector.shape_cast %6 : vector<18x4xf32> to vector<18x1x4xf32>
    tpu.vector_store %arg8[%c0, %c0_1, %c0_2], %9 {strides = array<i32>} : memref<18x18x4xf32, #tpu.memory_space<vmem>>, vector<18x1x4xf32>,
    %cst_3 = arith.constant 0.000000e+00 : f32
    %10 = vector.broadcast %cst_3 : f32 to vector<18x4xf32>
    %c0_4 = arith.constant 0 : index
    %c17 = arith.constant 17 : index
    %c0_5 = arith.constant 0 : index
    %11 = vector.load %arg8[%c0_4, %c17, %c0_5] : memref<18x18x4xf32, #tpu.memory_space<vmem>>, vector<18x1x4xf32>
    %12 = vector.shape_cast %11 : vector<18x1x4xf32> to vector<18x4xf32>
    %13 = vector.shape_cast %10 : vector<18x4xf32> to vector<18x1x4xf32>
    tpu.vector_store %arg8[%c0_4, %c17, %c0_5], %13 {strides = array<i32>} : memref<18x18x4xf32, #tpu.memory_space<vmem>>, vector<18x1x4xf32>,
    %c0_6 = arith.constant 0 : index
    %c0_7 = arith.constant 0 : index
    %c0_8 = arith.constant 0 : index
    %c0_9 = arith.constant 0 : index
    %14 = vector.load %arg3[%c0_6, %c0_7, %c0_8, %c0_9] : memref<1x1x16x4xf32, #tpu.memory_space<vmem>>, vector<1x1x16x4xf32>
    %15 = vector.shape_cast %14 : vector<1x1x16x4xf32> to vector<16x4xf32>
    %16 = vector.broadcast %2 : f32 to vector<16x4xf32>
    %17 = arith.mulf %15, %16 : vector<16x4xf32>
    %c0_10 = arith.constant 0 : index
    %c1 = arith.constant 1 : index
    %c0_11 = arith.constant 0 : index
    %18 = vector.load %arg8[%c0_10, %c1, %c0_11] : memref<18x18x4xf32, #tpu.memory_space<vmem>>, vector<1x16x4xf32>
    %19 = vector.shape_cast %18 : vector<1x16x4xf32> to vector<16x4xf32>
    %20 = vector.shape_cast %17 : vector<16x4xf32> to vector<1x16x4xf32>
    tpu.vector_store %arg8[%c0_10, %c1, %c0_11], %20 {strides = array<i32>} : memref<18x18x4xf32, #tpu.memory_space<vmem>>, vector<1x16x4xf32>,
    %c0_12 = arith.constant 0 : index
    %c0_13 = arith.constant 0 : index
    %c0_14 = arith.constant 0 : index
    %c0_15 = arith.constant 0 : index
    %21 = vector.load %arg4[%c0_12, %c0_13, %c0_14, %c0_15] : memref<1x1x16x4xf32, #tpu.memory_space<vmem>>, vector<1x1x16x4xf32>
    %22 = vector.shape_cast %21 : vector<1x1x16x4xf32> to vector<16x4xf32>
    %23 = vector.broadcast %5 : f32 to vector<16x4xf32>
    %24 = arith.mulf %22, %23 : vector<16x4xf32>
    %c17_16 = arith.constant 17 : index
    %c1_17 = arith.constant 1 : index
    %c0_18 = arith.constant 0 : index
    %25 = vector.load %arg8[%c17_16, %c1_17, %c0_18] : memref<18x18x4xf32, #tpu.memory_space<vmem>>, vector<1x16x4xf32>
    %26 = vector.shape_cast %25 : vector<1x16x4xf32> to vector<16x4xf32>
    %27 = vector.shape_cast %24 : vector<16x4xf32> to vector<1x16x4xf32>
    tpu.vector_store %arg8[%c17_16, %c1_17, %c0_18], %27 {strides = array<i32>} : memref<18x18x4xf32, #tpu.memory_space<vmem>>, vector<1x16x4xf32>,
    %c0_19 = arith.constant 0 : index
    %c0_20 = arith.constant 0 : index
    %c0_21 = arith.constant 0 : index
    %c0_22 = arith.constant 0 : index
    %28 = vector.load %arg2[%c0_19, %c0_20, %c0_21, %c0_22] : memref<1x16x16x4xf32, #tpu.memory_space<vmem>>, vector<1x16x16x4xf32>
    %29 = vector.shape_cast %28 : vector<1x16x16x4xf32> to vector<16x16x4xf32>
    %c1_23 = arith.constant 1 : index
    %c1_24 = arith.constant 1 : index
    %c0_25 = arith.constant 0 : index
    %30 = vector.load %arg8[%c1_23, %c1_24, %c0_25] : memref<18x18x4xf32, #tpu.memory_space<vmem>>, vector<16x16x4xf32>
    tpu.vector_store %arg8[%c1_23, %c1_24, %c0_25], %29 {strides = array<i32>} : memref<18x18x4xf32, #tpu.memory_space<vmem>>, vector<16x16x4xf32>,
    %cst_26 = arith.constant 0.000000e+00 : f32
    %31 = vector.broadcast %cst_26 : f32 to vector<256x32xf32>
    %c0_27 = arith.constant 0 : index
    %c0_28 = arith.constant 0 : index
    %c0_29 = arith.constant 0 : index
    %32 = vector.load %arg8[%c0_27, %c0_28, %c0_29] : memref<18x18x4xf32, #tpu.memory_space<vmem>>, vector<16x16x4xf32>
    %33 = vector.shape_cast %32 : vector<16x16x4xf32> to vector<256x4xf32>
    %c0_30 = arith.constant 0 : index
    %c0_31 = arith.constant 0 : index
    %c0_32 = arith.constant 0 : index
    %34 = vector.load %arg5[%c0_30, %c0_31, %c0_32] : memref<9x4x32xf32, #tpu.memory_space<vmem>>, vector<1x4x32xf32>
    %35 = vector.shape_cast %34 : vector<1x4x32xf32> to vector<4x32xf32>
    %cst_33 = arith.constant dense<0.000000e+00> : vector<256x32xf32>
    %36 = tpu.matmul %33, %35, %cst_33 {dimension_numbers = #tpu.dot_dimension_numbers<[1], [0], [0], [1], [0, 0, 1, 1], [], []>} : vector<256x4xf32>, vector<4x32xf32>, vector<256x32xf32> -> vector<256x32xf32>
    %37 = arith.addf %31, %36 : vector<256x32xf32>
    %c0_34 = arith.constant 0 : index
    %c1_35 = arith.constant 1 : index
    %c0_36 = arith.constant 0 : index
    %38 = vector.load %arg8[%c0_34, %c1_35, %c0_36] : memref<18x18x4xf32, #tpu.memory_space<vmem>>, vector<16x16x4xf32>
    %39 = vector.shape_cast %38 : vector<16x16x4xf32> to vector<256x4xf32>
    %c1_37 = arith.constant 1 : index
    %c0_38 = arith.constant 0 : index
    %c0_39 = arith.constant 0 : index
    %40 = vector.load %arg5[%c1_37, %c0_38, %c0_39] : memref<9x4x32xf32, #tpu.memory_space<vmem>>, vector<1x4x32xf32>
    %41 = vector.shape_cast %40 : vector<1x4x32xf32> to vector<4x32xf32>
    %cst_40 = arith.constant dense<0.000000e+00> : vector<256x32xf32>
    %42 = tpu.matmul %39, %41, %cst_40 {dimension_numbers = #tpu.dot_dimension_numbers<[1], [0], [0], [1], [0, 0, 1, 1], [], []>} : vector<256x4xf32>, vector<4x32xf32>, vector<256x32xf32> -> vector<256x32xf32>
    %43 = arith.addf %37, %42 : vector<256x32xf32>
    %c0_41 = arith.constant 0 : index
    %c2 = arith.constant 2 : index
    %c0_42 = arith.constant 0 : index
    %44 = vector.load %arg8[%c0_41, %c2, %c0_42] : memref<18x18x4xf32, #tpu.memory_space<vmem>>, vector<16x16x4xf32>
    %45 = vector.shape_cast %44 : vector<16x16x4xf32> to vector<256x4xf32>
    %c2_43 = arith.constant 2 : index
    %c0_44 = arith.constant 0 : index
    %c0_45 = arith.constant 0 : index
    %46 = vector.load %arg5[%c2_43, %c0_44, %c0_45] : memref<9x4x32xf32, #tpu.memory_space<vmem>>, vector<1x4x32xf32>
    %47 = vector.shape_cast %46 : vector<1x4x32xf32> to vector<4x32xf32>
    %cst_46 = arith.constant dense<0.000000e+00> : vector<256x32xf32>
    %48 = tpu.matmul %45, %47, %cst_46 {dimension_numbers = #tpu.dot_dimension_numbers<[1], [0], [0], [1], [0, 0, 1, 1], [], []>} : vector<256x4xf32>, vector<4x32xf32>, vector<256x32xf32> -> vector<256x32xf32>
    %49 = arith.addf %43, %48 : vector<256x32xf32>
    %c1_47 = arith.constant 1 : index
    %c0_48 = arith.constant 0 : index
    %c0_49 = arith.constant 0 : index
    %50 = vector.load %arg8[%c1_47, %c0_48, %c0_49] : memref<18x18x4xf32, #tpu.memory_space<vmem>>, vector<16x16x4xf32>
    %51 = vector.shape_cast %50 : vector<16x16x4xf32> to vector<256x4xf32>
    %c3 = arith.constant 3 : index
    %c0_50 = arith.constant 0 : index
    %c0_51 = arith.constant 0 : index
    %52 = vector.load %arg5[%c3, %c0_50, %c0_51] : memref<9x4x32xf32, #tpu.memory_space<vmem>>, vector<1x4x32xf32>
    %53 = vector.shape_cast %52 : vector<1x4x32xf32> to vector<4x32xf32>
    %cst_52 = arith.constant dense<0.000000e+00> : vector<256x32xf32>
    %54 = tpu.matmul %51, %53, %cst_52 {dimension_numbers = #tpu.dot_dimension_numbers<[1], [0], [0], [1], [0, 0, 1, 1], [], []>} : vector<256x4xf32>, vector<4x32xf32>, vector<256x32xf32> -> vector<256x32xf32>
    %55 = arith.addf %49, %54 : vector<256x32xf32>
    %c1_53 = arith.constant 1 : index
    %c1_54 = arith.constant 1 : index
    %c0_55 = arith.constant 0 : index
    %56 = vector.load %arg8[%c1_53, %c1_54, %c0_55] : memref<18x18x4xf32, #tpu.memory_space<vmem>>, vector<16x16x4xf32>
    %57 = vector.shape_cast %56 : vector<16x16x4xf32> to vector<256x4xf32>
    %c4 = arith.constant 4 : index
    %c0_56 = arith.constant 0 : index
    %c0_57 = arith.constant 0 : index
    %58 = vector.load %arg5[%c4, %c0_56, %c0_57] : memref<9x4x32xf32, #tpu.memory_space<vmem>>, vector<1x4x32xf32>
    %59 = vector.shape_cast %58 : vector<1x4x32xf32> to vector<4x32xf32>
    %cst_58 = arith.constant dense<0.000000e+00> : vector<256x32xf32>
    %60 = tpu.matmul %57, %59, %cst_58 {dimension_numbers = #tpu.dot_dimension_numbers<[1], [0], [0], [1], [0, 0, 1, 1], [], []>} : vector<256x4xf32>, vector<4x32xf32>, vector<256x32xf32> -> vector<256x32xf32>
    %61 = arith.addf %55, %60 : vector<256x32xf32>
    %c1_59 = arith.constant 1 : index
    %c2_60 = arith.constant 2 : index
    %c0_61 = arith.constant 0 : index
    %62 = vector.load %arg8[%c1_59, %c2_60, %c0_61] : memref<18x18x4xf32, #tpu.memory_space<vmem>>, vector<16x16x4xf32>
    %63 = vector.shape_cast %62 : vector<16x16x4xf32> to vector<256x4xf32>
    %c5 = arith.constant 5 : index
    %c0_62 = arith.constant 0 : index
    %c0_63 = arith.constant 0 : index
    %64 = vector.load %arg5[%c5, %c0_62, %c0_63] : memref<9x4x32xf32, #tpu.memory_space<vmem>>, vector<1x4x32xf32>
    %65 = vector.shape_cast %64 : vector<1x4x32xf32> to vector<4x32xf32>
    %cst_64 = arith.constant dense<0.000000e+00> : vector<256x32xf32>
    %66 = tpu.matmul %63, %65, %cst_64 {dimension_numbers = #tpu.dot_dimension_numbers<[1], [0], [0], [1], [0, 0, 1, 1], [], []>} : vector<256x4xf32>, vector<4x32xf32>, vector<256x32xf32> -> vector<256x32xf32>
    %67 = arith.addf %61, %66 : vector<256x32xf32>
    %c2_65 = arith.constant 2 : index
    %c0_66 = arith.constant 0 : index
    %c0_67 = arith.constant 0 : index
    %68 = vector.load %arg8[%c2_65, %c0_66, %c0_67] : memref<18x18x4xf32, #tpu.memory_space<vmem>>, vector<16x16x4xf32>
    %69 = vector.shape_cast %68 : vector<16x16x4xf32> to vector<256x4xf32>
    %c6 = arith.constant 6 : index
    %c0_68 = arith.constant 0 : index
    %c0_69 = arith.constant 0 : index
    %70 = vector.load %arg5[%c6, %c0_68, %c0_69] : memref<9x4x32xf32, #tpu.memory_space<vmem>>, vector<1x4x32xf32>
    %71 = vector.shape_cast %70 : vector<1x4x32xf32> to vector<4x32xf32>
    %cst_70 = arith.constant dense<0.000000e+00> : vector<256x32xf32>
    %72 = tpu.matmul %69, %71, %cst_70 {dimension_numbers = #tpu.dot_dimension_numbers<[1], [0], [0], [1], [0, 0, 1, 1], [], []>} : vector<256x4xf32>, vector<4x32xf32>, vector<256x32xf32> -> vector<256x32xf32>
    %73 = arith.addf %67, %72 : vector<256x32xf32>
    %c2_71 = arith.constant 2 : index
    %c1_72 = arith.constant 1 : index
    %c0_73 = arith.constant 0 : index
    %74 = vector.load %arg8[%c2_71, %c1_72, %c0_73] : memref<18x18x4xf32, #tpu.memory_space<vmem>>, vector<16x16x4xf32>
    %75 = vector.shape_cast %74 : vector<16x16x4xf32> to vector<256x4xf32>
    %c7 = arith.constant 7 : index
    %c0_74 = arith.constant 0 : index
    %c0_75 = arith.constant 0 : index
    %76 = vector.load %arg5[%c7, %c0_74, %c0_75] : memref<9x4x32xf32, #tpu.memory_space<vmem>>, vector<1x4x32xf32>
    %77 = vector.shape_cast %76 : vector<1x4x32xf32> to vector<4x32xf32>
    %cst_76 = arith.constant dense<0.000000e+00> : vector<256x32xf32>
    %78 = tpu.matmul %75, %77, %cst_76 {dimension_numbers = #tpu.dot_dimension_numbers<[1], [0], [0], [1], [0, 0, 1, 1], [], []>} : vector<256x4xf32>, vector<4x32xf32>, vector<256x32xf32> -> vector<256x32xf32>
    %79 = arith.addf %73, %78 : vector<256x32xf32>
    %c2_77 = arith.constant 2 : index
    %c2_78 = arith.constant 2 : index
    %c0_79 = arith.constant 0 : index
    %80 = vector.load %arg8[%c2_77, %c2_78, %c0_79] : memref<18x18x4xf32, #tpu.memory_space<vmem>>, vector<16x16x4xf32>
    %81 = vector.shape_cast %80 : vector<16x16x4xf32> to vector<256x4xf32>
    %c8 = arith.constant 8 : index
    %c0_80 = arith.constant 0 : index
    %c0_81 = arith.constant 0 : index
    %82 = vector.load %arg5[%c8, %c0_80, %c0_81] : memref<9x4x32xf32, #tpu.memory_space<vmem>>, vector<1x4x32xf32>
    %83 = vector.shape_cast %82 : vector<1x4x32xf32> to vector<4x32xf32>
    %cst_82 = arith.constant dense<0.000000e+00> : vector<256x32xf32>
    %84 = tpu.matmul %81, %83, %cst_82 {dimension_numbers = #tpu.dot_dimension_numbers<[1], [0], [0], [1], [0, 0, 1, 1], [], []>} : vector<256x4xf32>, vector<4x32xf32>, vector<256x32xf32> -> vector<256x32xf32>
    %85 = arith.addf %79, %84 : vector<256x32xf32>
    %c0_83 = arith.constant 0 : index
    %c0_84 = arith.constant 0 : index
    %86 = vector.load %arg6[%c0_83, %c0_84] : memref<1x32xf32, #tpu.memory_space<vmem>>, vector<1x32xf32>
    %87 = vector.broadcast %86 : vector<1x32xf32> to vector<256x32xf32>
    %88 = arith.addf %85, %87 : vector<256x32xf32>
    %cst_85 = arith.constant 0.000000e+00 : f32
    %89 = vector.broadcast %cst_85 : f32 to vector<256x32xf32>
    %90 = arith.cmpf ogt, %88, %89 : vector<256x32xf32>
    %cst_86 = arith.constant 0.000000e+00 : f32
    %91 = vector.broadcast %cst_86 : f32 to vector<256x32xf32>
    %92 = arith.minimumf %88, %91 : vector<256x32xf32>
    %93 = math.exp %92 : vector<256x32xf32>
    %cst_87 = arith.constant 1.000000e+00 : f32
    %94 = vector.broadcast %cst_87 : f32 to vector<256x32xf32>
    %95 = arith.subf %93, %94 : vector<256x32xf32>
    %96 = arith.select %90, %88, %95 : vector<256x32xi1>, vector<256x32xf32>
    %c0_88 = arith.constant 0 : index
    %c0_89 = arith.constant 0 : index
    %c0_90 = arith.constant 0 : index
    %97 = vector.load %arg7[%c0_88, %c0_89, %c0_90] : memref<1x256x32xf32, #tpu.memory_space<vmem>>, vector<1x256x32xf32>
    %98 = vector.shape_cast %97 : vector<1x256x32xf32> to vector<256x32xf32>
    %99 = vector.shape_cast %96 : vector<256x32xf32> to vector<1x256x32xf32>
    tpu.vector_store %arg7[%c0_88, %c0_89, %c0_90], %99 {strides = array<i32>} : memref<1x256x32xf32, #tpu.memory_space<vmem>>, vector<1x256x32xf32>,
    return
  }
  func.func @transform_0(%arg0: i32, %arg1: i32) -> (i32, i32, i32, i32) {
    %c0_i32 = arith.constant 0 : i32
    %c0_i32_0 = arith.constant 0 : i32
    %c0_i32_1 = arith.constant 0 : i32
    return %arg0, %arg1, %c0_i32, %c0_i32_0 : i32, i32, i32, i32
  }
  func.func @transform_1(%arg0: i32, %arg1: i32) -> (i32, i32, i32, i32) {
    %c16_i32 = arith.constant 16 : i32
    %0 = arith.muli %arg1, %c16_i32 : i32
    %c1_i32 = arith.constant 1 : i32
    %1 = arith.subi %0, %c1_i32 : i32
    %c0_i32 = arith.constant 0 : i32
    %2 = arith.maxsi %1, %c0_i32 : i32
    %c0_i32_0 = arith.constant 0 : i32
    %c0_i32_1 = arith.constant 0 : i32
    %c0_i32_2 = arith.constant 0 : i32
    return %arg0, %2, %c0_i32_0, %c0_i32_1 : i32, i32, i32, i32
  }
  func.func @transform_2(%arg0: i32, %arg1: i32) -> (i32, i32, i32, i32) {
    %c16_i32 = arith.constant 16 : i32
    %0 = arith.muli %arg1, %c16_i32 : i32
    %c16_i32_0 = arith.constant 16 : i32
    %1 = arith.addi %0, %c16_i32_0 : i32
    %c15_i32 = arith.constant 15 : i32
    %2 = arith.minsi %1, %c15_i32 : i32
    %c0_i32 = arith.constant 0 : i32
    %c0_i32_1 = arith.constant 0 : i32
    %c0_i32_2 = arith.constant 0 : i32
    return %arg0, %2, %c0_i32, %c0_i32_1 : i32, i32, i32, i32
  }
  func.func @transform_3(%arg0: i32, %arg1: i32) -> (i32, i32, i32) {
    %c0_i32 = arith.constant 0 : i32
    %c0_i32_0 = arith.constant 0 : i32
    %c0_i32_1 = arith.constant 0 : i32
    %c0_i32_2 = arith.constant 0 : i32
    return %c0_i32, %c0_i32_0, %c0_i32_1 : i32, i32, i32
  }
  func.func @transform_4(%arg0: i32, %arg1: i32) -> (i32, i32) {
    %c0_i32 = arith.constant 0 : i32
    %c0_i32_0 = arith.constant 0 : i32
    %c0_i32_1 = arith.constant 0 : i32
    return %c0_i32, %c0_i32_0 : i32, i32
  }
  func.func @transform_5(%arg0: i32, %arg1: i32) -> (i32, i32, i32) {
    %c0_i32 = arith.constant 0 : i32
    %c0_i32_0 = arith.constant 0 : i32
    return %arg0, %arg1, %c0_i32 : i32, i32, i32
  }
}

</mosaic_0001>

<bundles_post_ra>
// kernel: upsample_forward_packed.1
= control target key start
LH: loop header
LB: loop body
LE: loop exit
PB: predicated region body
PF: predicated region fallthrough
CT: control target
= control target key end

     0   :  { %s5866_s18 = smov 0   ;;  %s5868_s19 = smov 0   ;;  %s7121_s0 = inlined_call_operand.vmem [shape: f32[2,16,16,4], index: 0, kind: input, shape index: {}, may-alias: {0,1,2}]   ;;  %s7122_s1 = inlined_call_operand.vmem [shape: f32[2,16,16,4], index: 1, kind: input, shape index: {}, may-alias: {0,1,2}]   ;;  %s7123_s2 = inlined_call_operand.vmem [shape: f32[2,16,16,4], index: 2, kind: input, shape index: {}, may-alias: {0,1,2}]   ;;  %s7124_s3 = inlined_call_operand.vmem [shape: f32[9,4,32], index: 3, kind: input, shape index: {}]   ;;  %s7125_s4 = inlined_call_operand.vmem [shape: f32[1,32], index: 4, kind: input, shape index: {}]   ;;  %s7126_s5 = inlined_call_operand.vmem [shape: f32[2,256,32], index: 5, kind: output, shape index: {}]  }
   0x1   :  { %s5870_s20 = smov 0  }
   0x2 LB: > { %s27_s21 = sadd.s32 1, %s5829_s19  ;;  %p4362_p0 = scmp.ge.s32.totalorder %s5833_s20, 1  ;;  %s5833_s20 = sphi %s5870_s20, %s15_s20   ;;  %s5829_s19 = sphi %s5868_s19, %s7236_s19   ;;  %s5825_s18 = sphi %s5866_s18, %s7235_s18  }
   0x3   : > { %p29_p1 = scmp.ge.s32.totalorder %s27_s21, 2  ;;  %p273_p2 = scmp.lt.s32.totalorder %s5833_s20, 3 }
   0x5   : > { %s7238_s21 = smov (%p29_p1, %s27_s21), 0  ;;  %p274_p3 = pnand %p4362_p0, %p273_p2 }
   0x7   : > { %277 = sbr.rel (%p274_p3) target bundleno = 566 (0x236), region = 40 }
   0xe   : > { %vm678_vm0 = vcmask 1043456   ;;  %v5887_v0 = vld [vmem:[%s7124_s3 + $0x10] sm:$0xf]  ;;  %v4371_v1 = vld [vmem:[%s7124_s3 + $0x4] sm:$0xf]  ;;  %p337_p4 = scmp.lt.s32.totalorder %s5825_s18, 1 }
   0xf   : > { %5214 = vmatprep.subr.msk.mxu0 %vm678_vm0, %v5887_v0  ;;  %5014 = vmatprep.subr.msk.mxu1 %vm678_vm0, %v4371_v1  ;;  %v5898_v2 = vld [vmem:[%s7124_s3] sm:$0xf]  ;;  %v5903_v3 = vld [vmem:[%s7124_s3 + $0x14] sm:$0xf]  ;;  %vm397_vm1 = vcmask 24576   ;;  %v5835_v4 = vmov 0.0  }
  0x10   : > { %5215 = vmatpush3.msk.msra.mxu0 %vm678_vm0, %v5887_v0  ;;  %s7240_s18 = smov (!%p337_p4, %s5825_s18), 1  ;;  %5015 = vmatpush3.msk.msra.mxu1 %vm678_vm0, %v4371_v1  ;;  %417 = vst.msk [vmem:[#allocation2 + $0x29] sm:$0x1] %vm397_vm1, %v5835_v4  ;;  %398 = vst.msk [vmem:[#allocation2] sm:$0x1] %vm397_vm1, %v5835_v4  ;;  %vm439_vm2 = vcmask 31744  }
  0x11   : > { %5064 = vmatprep.subr.msk.mxu1 %vm678_vm0, %v5898_v2  ;;  %5264 = vmatprep.subr.msk.mxu0 %vm678_vm0, %v5903_v3  ;;  %399 = vst.msk [vmem:[#allocation2 + $0x18] sm:$0x1] %vm397_vm1, %v5835_v4  ;;  %400 = vst.msk [vmem:[#allocation2 + $0x30] sm:$0x1] %vm397_vm1, %v5835_v4  ;;  %s5951_s30 = sshll.u32 %s7240_s18, 8  ;;  %vm4193_vm3 = vcmask 261120  }
  0x12   : > { %401 = vst.msk [vmem:[#allocation2 + $0x48] sm:$0x1] %vm397_vm1, %v5835_v4  ;;  %402 = vst.msk [vmem:[#allocation2 + $0x60] sm:$0x1] %vm397_vm1, %v5835_v4  ;;  %s5957_s8 = scalar_lea.vmem %s7121_s0, %s5951_s30  ;;  %s359_s11 = scalar_lea.vmem %s7122_s1, %s5951_s30  ;;  %v6021_v37 = vld [vmem:[%s7124_s3 + $0x18] sm:$0xf] }
  0x13   : > { %403 = vst.msk [vmem:[#allocation2 + $0x78] sm:$0x1] %vm397_vm1, %v5835_v4  ;;  %404 = vst.msk [vmem:[#allocation2 + $0x90] sm:$0x1] %vm397_vm1, %v5835_v4  ;;  %v450_v5 = vld [vmem:[%s5957_s8] sm:$0xff]  ;;  %v451_v6 = vld [vmem:[%s5957_s8 + $0x8] sm:$0xff]  ;;  %s6889_s9 = scalar_lea.vmem %s7126_s5, %s5951_s30 }
  0x14   : > { %405 = vst.msk [vmem:[#allocation2 + $0xa8] sm:$0x1] %vm397_vm1, %v5835_v4  ;;  %406 = vst.msk [vmem:[#allocation2 + $0xc0] sm:$0x1] %vm397_vm1, %v5835_v4  ;;  %v434_v7 = vld [vmem:[%s359_s11] sm:$0xff]  ;;  %v435_v8 = vld [vmem:[%s359_s11 + $0x8] sm:$0xff] }
  0x15   : > { %407 = vst.msk [vmem:[#allocation2 + $0xd8] sm:$0x1] %vm397_vm1, %v5835_v4  ;;  %408 = vst.msk [vmem:[#allocation2 + $0xf0] sm:$0x1] %vm397_vm1, %v5835_v4  ;;  %v437_v9 = vmul.f32 0.0, %v434_v7  ;;  %v452_v10 = vld [vmem:[%s5957_s8 + $0x10] sm:$0xff] }
  0x16   : > { %409 = vst.msk [vmem:[#allocation2 + $0x108] sm:$0x1] %vm397_vm1, %v5835_v4  ;;  %410 = vst.msk [vmem:[#allocation2 + $0x120] sm:$0x1] %vm397_vm1, %v5835_v4  ;;  %v453_v11 = vld [vmem:[%s5957_s8 + $0x18] sm:$0xff]  ;;  %v438_v12 = vmul.f32 0.0, %v435_v8 }
  0x17   : > { %411 = vst.msk [vmem:[#allocation2 + $0x138] sm:$0x1] %vm397_vm1, %v5835_v4  ;;  %412 = vst.msk [vmem:[#allocation2 + $0x150] sm:$0x1] %vm397_vm1, %v5835_v4  ;;  %v454_v13 = vld [vmem:[%s5957_s8 + $0x20] sm:$0xff]  ;;  %v455_v14 = vld [vmem:[%s5957_s8 + $0x28] sm:$0xff] }
  0x18   : > { %413 = vst.msk [vmem:[#allocation2 + $0x168] sm:$0x1] %vm397_vm1, %v5835_v4  ;;  %414 = vst.msk [vmem:[#allocation2 + $0x180] sm:$0x1] %vm397_vm1, %v5835_v4  ;;  %v456_v15 = vld [vmem:[%s5957_s8 + $0x30] sm:$0xff]  ;;  %v457_v16 = vld [vmem:[%s5957_s8 + $0x38] sm:$0xff] }
  0x19   : > { %415 = vst.msk [vmem:[#allocation2 + $0x198] sm:$0x1] %vm397_vm1, %v5835_v4  ;;  %416 = vst.msk [vmem:[#allocation2 + $0x11] sm:$0x1] %vm397_vm1, %v5835_v4  ;;  %v458_v17 = vld [vmem:[%s5957_s8 + $0x40] sm:$0xff]  ;;  %v459_v18 = vld [vmem:[%s5957_s8 + $0x48] sm:$0xff] }
  0x1a   : > { %418 = vst.msk [vmem:[#allocation2 + $0x41] sm:$0x1] %vm397_vm1, %v5835_v4  ;;  %419 = vst.msk [vmem:[#allocation2 + $0x59] sm:$0x1] %vm397_vm1, %v5835_v4  ;;  %v460_v19 = vld [vmem:[%s5957_s8 + $0x50] sm:$0xff]  ;;  %v461_v20 = vld [vmem:[%s5957_s8 + $0x58] sm:$0xff] }
  0x1b   : > { %420 = vst.msk [vmem:[#allocation2 + $0x71] sm:$0x1] %vm397_vm1, %v5835_v4  ;;  %421 = vst.msk [vmem:[#allocation2 + $0x89] sm:$0x1] %vm397_vm1, %v5835_v4  ;;  %v462_v21 = vld [vmem:[%s5957_s8 + $0x60] sm:$0xff]  ;;  %v463_v22 = vld [vmem:[%s5957_s8 + $0x68] sm:$0xff] }
  0x1c   : > { %422 = vst.msk [vmem:[#allocation2 + $0xa1] sm:$0x1] %vm397_vm1, %v5835_v4  ;;  %423 = vst.msk [vmem:[#allocation2 + $0xb9] sm:$0x1] %vm397_vm1, %v5835_v4  ;;  %v464_v23 = vld [vmem:[%s5957_s8 + $0x70] sm:$0xff]  ;;  %v465_v24 = vld [vmem:[%s5957_s8 + $0x78] sm:$0xff] }
  0x1d   : > { %424 = vst.msk [vmem:[#allocation2 + $0xd1] sm:$0x1] %vm397_vm1, %v5835_v4  ;;  %425 = vst.msk [vmem:[#allocation2 + $0xe9] sm:$0x1] %vm397_vm1, %v5835_v4  ;;  %v466_v25 = vld [vmem:[%s5957_s8 + $0x80] sm:$0xff]  ;;  %v467_v26 = vld [vmem:[%s5957_s8 + $0x88] sm:$0xff] }
  0x1e   : > { %426 = vst.msk [vmem:[#allocation2 + $0x101] sm:$0x1] %vm397_vm1, %v5835_v4  ;;  %427 = vst.msk [vmem:[#allocation2 + $0x119] sm:$0x1] %vm397_vm1, %v5835_v4  ;;  %v468_v27 = vld [vmem:[%s5957_s8 + $0x90] sm:$0xff]  ;;  %v469_v28 = vld [vmem:[%s5957_s8 + $0x98] sm:$0xff] }
  0x1f   : > { %428 = vst.msk [vmem:[#allocation2 + $0x131] sm:$0x1] %vm397_vm1, %v5835_v4  ;;  %429 = vst.msk [vmem:[#allocation2 + $0x149] sm:$0x1] %vm397_vm1, %v5835_v4  ;;  %v470_v29 = vld [vmem:[%s5957_s8 + $0xa0] sm:$0xff]  ;;  %v471_v30 = vld [vmem:[%s5957_s8 + $0xa8] sm:$0xff] }
  0x20   : > { %430 = vst.msk [vmem:[#allocation2 + $0x161] sm:$0x1] %vm397_vm1, %v5835_v4  ;;  %431 = vst.msk [vmem:[#allocation2 + $0x179] sm:$0x1] %vm397_vm1, %v5835_v4  ;;  %v6031_v39 = vld [vmem:[%s7124_s3 + $0x8] sm:$0xf] }
  0x21   : > { %432 = vst.msk [vmem:[#allocation2 + $0x191] sm:$0x1] %vm397_vm1, %v5835_v4  ;;  %433 = vst.msk [vmem:[#allocation2 + $0x1a9] sm:$0x1] %vm397_vm1, %v5835_v4  ;;  %v472_v43 = vld [vmem:[%s5957_s8 + $0xb0] sm:$0xff]  ;;  %v473_v44 = vld [vmem:[%s5957_s8 + $0xb8] sm:$0xff] }
  0x22   : > { %483 = vst.msk [vmem:[#allocation2 + $0x19] sm:$0xff] %vm439_vm2, %v450_v5  ;;  %484 = vst.msk [vmem:[#allocation2 + $0x21] sm:$0xff] %vm439_vm2, %v451_v6  ;;  %v474_v46 = vld [vmem:[%s5957_s8 + $0xc0] sm:$0xff]  ;;  %v475_v47 = vld [vmem:[%s5957_s8 + $0xc8] sm:$0xff]  ;;  %s4714_s16 = sadd.s32 240, %s5951_s30 }
  0x23   : > { %485 = vst.msk [vmem:[#allocation2 + $0x31] sm:$0xff] %vm439_vm2, %v452_v10  ;;  %486 = vst.msk [vmem:[#allocation2 + $0x39] sm:$0xff] %vm439_vm2, %v453_v11  ;;  %v476_v48 = vld [vmem:[%s5957_s8 + $0xd0] sm:$0xff]  ;;  %v477_v49 = vld [vmem:[%s5957_s8 + $0xd8] sm:$0xff]  ;;  %s376_s22 = scalar_lea.vmem %s7123_s2, %s4714_s16 }
  0x24   : > { %440 = vst.msk [vmem:[#allocation2 + $0x1] sm:$0xff] %vm439_vm2, %v437_v9  ;;  %487 = vst.msk [vmem:[#allocation2 + $0x49] sm:$0xff] %vm439_vm2, %v454_v13  ;;  %v478_v51 = vld [vmem:[%s5957_s8 + $0xe0] sm:$0xff]  ;;  %v479_v52 = vld [vmem:[%s5957_s8 + $0xe8] sm:$0xff] }
  0x25   : > { %488 = vst.msk [vmem:[#allocation2 + $0x51] sm:$0xff] %vm439_vm2, %v455_v14  ;;  %489 = vst.msk [vmem:[#allocation2 + $0x61] sm:$0xff] %vm439_vm2, %v456_v15  ;;  %v480_v60 = vld [vmem:[%s5957_s8 + $0xf0] sm:$0xff]  ;;  %v481_v61 = vld [vmem:[%s5957_s8 + $0xf8] sm:$0xff] }
  0x26   : > { %441 = vst.msk [vmem:[#allocation2 + $0x9] sm:$0xff] %vm439_vm2, %v438_v12  ;;  %490 = vst.msk [vmem:[#allocation2 + $0x69] sm:$0xff] %vm439_vm2, %v457_v16  ;;  %v6150_v1 = vld [vmem:[%s7124_s3 + $0x1c] sm:$0xf]  ;;  %v442_v4 = vld [vmem:[%s376_s22] sm:$0xff] }
  0x27   : > { %491 = vst.msk [vmem:[#allocation2 + $0x79] sm:$0xff] %vm439_vm2, %v458_v17  ;;  %492 = vst.msk [vmem:[#allocation2 + $0x81] sm:$0xff] %vm439_vm2, %v459_v18  ;;  %v445_v6 = vmul.f32 0.0, %v442_v4  ;;  %v443_v8 = vld [vmem:[%s376_s22 + $0x8] sm:$0xff] }
  0x28   : > { %493 = vst.msk [vmem:[#allocation2 + $0x91] sm:$0xff] %vm439_vm2, %v460_v19  ;;  %494 = vst.msk [vmem:[#allocation2 + $0x99] sm:$0xff] %vm439_vm2, %v461_v20  ;;  %v446_v10 = vmul.f32 0.0, %v443_v8 }
  0x29   : > { %495 = vst.msk [vmem:[#allocation2 + $0xa9] sm:$0xff] %vm439_vm2, %v462_v21  ;;  %496 = vst.msk [vmem:[#allocation2 + $0xb1] sm:$0xff] %vm439_vm2, %v463_v22  ;;  %v2011_v31 = vld [vmem:[#allocation2 + $0x19] sm:$0xff]  ;;  %v2012_v32 = vld [vmem:[#allocation2 + $0x21] sm:$0xff] }
  0x2a   : > { %497 = vst.msk [vmem:[#allocation2 + $0xc1] sm:$0xff] %vm439_vm2, %v464_v23  ;;  %498 = vst.msk [vmem:[#allocation2 + $0xc9] sm:$0xff] %vm439_vm2, %v465_v24  ;;  %5216 = vmatprep.mubr.msk.f32.mxu0 %vm439_vm2, %v2011_v31  ;;  %v6010_v33 = vld [vmem:[#allocation2 + $0x31] sm:$0xff]  ;;  %v6016_v36 = vld [vmem:[#allocation2 + $0x39] sm:$0xff] }
  0x2b   : > { %499 = vst.msk [vmem:[#allocation2 + $0xd9] sm:$0xff] %vm439_vm2, %v466_v25  ;;  %500 = vst.msk [vmem:[#allocation2 + $0xe1] sm:$0xff] %vm439_vm2, %v467_v26  ;;  %5217 = vmatmul.mubr.msk.f32.vlgmr.msra.gmra.mrb[0].mxu0 %vm439_vm2, %v2012_v32  ;;  %v548_v34 = vld [vmem:[#allocation2 + $0x1] sm:$0xff]  ;;  %v6026_v38 = vld [vmem:[#allocation2 + $0x49] sm:$0xff] }
  0x2c   : > { %501 = vst.msk [vmem:[#allocation2 + $0xf1] sm:$0xff] %vm439_vm2, %v468_v27  ;;  %502 = vst.msk [vmem:[#allocation2 + $0xf9] sm:$0xff] %vm439_vm2, %v469_v28  ;;  %5016 = vmatprep.mubr.msk.f32.mxu1 %vm439_vm2, %v548_v34  ;;  %5265 = vmatpush3.msk.msra.mxu0 %vm678_vm0, %v5903_v3  ;;  %v6042_v40 = vld [vmem:[#allocation2 + $0x51] sm:$0xff]  ;;  %v6047_v41 = vld [vmem:[#allocation2 + $0x61] sm:$0xff] }
  0x2d   : > { %503 = vst.msk [vmem:[#allocation2 + $0x109] sm:$0xff] %vm439_vm2, %v470_v29  ;;  %504 = vst.msk [vmem:[#allocation2 + $0x111] sm:$0xff] %vm439_vm2, %v471_v30  ;;  %v549_v35 = vld [vmem:[#allocation2 + $0x9] sm:$0xff]  ;;  %5219 = vmatprep.mubr.msk.f32.mxu0 %vm439_vm2, %v6010_v33  ;;  %5314 = vmatprep.subr.msk.mxu0 %vm678_vm0, %v6021_v37  ;;  %v6123_v59 = vld [vmem:[#allocation2 + $0x1a] sm:$0xff] }
  0x2e   : > { %5017 = vmatmul.mubr.msk.f32.vlgmr.msra.gmra.mrb[0].mxu1 %vm439_vm2, %v549_v35  ;;  %v6055_v42 = vld [vmem:[#allocation2 + $0x69] sm:$0xff]  ;;  %v6061_v45 = vld [vmem:[#allocation2 + $0x79] sm:$0xff]  ;;  %505 = vst.msk [vmem:[#allocation2 + $0x121] sm:$0xff] %vm439_vm2, %v472_v43  ;;  %506 = vst.msk [vmem:[#allocation2 + $0x129] sm:$0xff] %vm439_vm2, %v473_v44 }
  0x2f   : > { %5065 = vmatpush3.msk.msra.mxu1 %vm678_vm0, %v5898_v2  ;;  %5019 = vmatprep.mubr.msk.f32.mxu1 %vm439_vm2, %v2011_v31  ;;  %507 = vst.msk [vmem:[#allocation2 + $0x139] sm:$0xff] %vm439_vm2, %v474_v46  ;;  %508 = vst.msk [vmem:[#allocation2 + $0x141] sm:$0xff] %vm439_vm2, %v475_v47  ;;  %v6077_v50 = vld [vmem:[#allocation2 + $0x81] sm:$0xff]  ;;  %v6085_v53 = vld [vmem:[#allocation2 + $0x91] sm:$0xff] }
  0x30   : > { %5220 = vmatmul.mubr.msk.f32.gmra.mrb[2].mxu0 %vm439_vm2, %v6016_v36  ;;  %5114 = vmatprep.subr.msk.mxu1 %vm678_vm0, %v6031_v39  ;;  %509 = vst.msk [vmem:[#allocation2 + $0x151] sm:$0xff] %vm439_vm2, %v476_v48  ;;  %510 = vst.msk [vmem:[#allocation2 + $0x159] sm:$0xff] %vm439_vm2, %v477_v49  ;;  %v6095_v54 = vld [vmem:[#allocation2 + $0x99] sm:$0xff]  ;;  %v6099_v55 = vld [vmem:[#allocation2 + $0xa9] sm:$0xff] }
  0x31   : > { %5222 = vmatprep.mubr.msk.f32.mxu0 %vm439_vm2, %v6026_v38  ;;  %511 = vst.msk [vmem:[#allocation2 + $0x169] sm:$0xff] %vm439_vm2, %v478_v51  ;;  %512 = vst.msk [vmem:[#allocation2 + $0x171] sm:$0xff] %vm439_vm2, %v479_v52  ;;  %v6107_v56 = vld [vmem:[#allocation2 + $0xb1] sm:$0xff]  ;;  %v6111_v57 = vld [vmem:[#allocation2 + $0xc1] sm:$0xff] }
  0x32   : > { %5020 = vmatmul.mubr.msk.f32.gmra.mrb[2].mxu1 %vm439_vm2, %v2012_v32  ;;  %v6119_v58 = vld [vmem:[#allocation2 + $0xc9] sm:$0xff]  ;;  %513 = vst.msk [vmem:[#allocation2 + $0x181] sm:$0xff] %vm439_vm2, %v480_v60  ;;  %514 = vst.msk [vmem:[#allocation2 + $0x189] sm:$0xff] %vm439_vm2, %v481_v61  ;;  %v6140_v63 = vld [vmem:[#allocation2 + $0x32] sm:$0xff] }
  0x33   : > { %5022 = vmatprep.mubr.msk.f32.mxu1 %vm439_vm2, %v6010_v33  ;;  %v6136_v62 = vld [vmem:[#allocation2 + $0x22] sm:$0xff]  ;;  %v6154_v2 = vld [vmem:[#allocation2 + $0xd9] sm:$0xff]  ;;  %v6164_v5 = vld [vmem:[#allocation2 + $0x4a] sm:$0xff]  ;;  %448 = vst.msk [vmem:[#allocation2 + $0x199] sm:$0xff] %vm439_vm2, %v445_v6 }
  0x34   : > { %5223 = vmatmul.mubr.msk.f32.gmra.mrb[4].mxu0 %vm439_vm2, %v6042_v40  ;;  %v6160_v3 = vld [vmem:[#allocation2 + $0x3a] sm:$0xff]  ;;  %v6174_v9 = vld [vmem:[#allocation2 + $0xf1] sm:$0xff]  ;;  %v6183_v12 = vld [vmem:[#allocation2 + $0x62] sm:$0xff]  ;;  %449 = vst.msk [vmem:[#allocation2 + $0x1a1] sm:$0xff] %vm439_vm2, %v446_v10 }
  0x35   : > { %5225 = vmatprep.mubr.msk.f32.mxu0 %vm439_vm2, %v6047_v41  ;;  %v6170_v7 = vld [vmem:[#allocation2 + $0xe1] sm:$0xff]  ;;  %7171 = vst [vmem:[#allocation3_spill] sm:$0xff] %v6174_v9  ;;  %v6179_v11 = vld [vmem:[#allocation2 + $0x52] sm:$0xff]  ;;  %v6192_v14 = vld [vmem:[#allocation2 + $0x109] sm:$0xff] }
  0x36   : > { %5023 = vmatmul.mubr.msk.f32.gmra.mrb[4].mxu1 %vm439_vm2, %v6016_v36  ;;  %v6188_v13 = vld [vmem:[#allocation2 + $0xf9] sm:$0xff]  ;;  %7173 = vst [vmem:[#allocation5_spill] sm:$0xff] %v6192_v14  ;;  %v6196_v15 = vld [vmem:[#allocation2 + $0x6a] sm:$0xff]  ;;  %v6208_v18 = vld [vmem:[#allocation2 + $0x121] sm:$0xff] }
  0x37   : > { %5025 = vmatprep.mubr.msk.f32.mxu1 %vm439_vm2, %v6026_v38  ;;  %7172 = vst [vmem:[#allocation4_spill] sm:$0xff] %v6188_v13  ;;  %v6200_v16 = vld [vmem:[#allocation2 + $0x7a] sm:$0xff]  ;;  %v6204_v17 = vld [vmem:[#allocation2 + $0x111] sm:$0xff]  ;;  %7175 = vst [vmem:[#allocation7_spill] sm:$0xff] %v6208_v18 }
  0x38   : > { %5226 = vmatmul.mubr.msk.f32.gmra.mrb[6].mxu0 %vm439_vm2, %v6055_v42  ;;  %7174 = vst [vmem:[#allocation6_spill] sm:$0xff] %v6204_v17  ;;  %v6212_v19 = vld [vmem:[#allocation2 + $0x82] sm:$0xff]  ;;  %v6216_v20 = vld [vmem:[#allocation2 + $0x92] sm:$0xff]  ;;  %v6228_v23 = vld [vmem:[#allocation2 + $0x9a] sm:$0xff] }
  0x39   : > { %5228 = vmatprep.mubr.msk.f32.mxu0 %vm439_vm2, %v6061_v45  ;;  %v6220_v21 = vld [vmem:[#allocation2 + $0x129] sm:$0xff]  ;;  %v6224_v22 = vld [vmem:[#allocation2 + $0x139] sm:$0xff]  ;;  %v6236_v25 = vld [vmem:[#allocation2 + $0x141] sm:$0xff] }
  0x3a   : > { %5026 = vmatmul.mubr.msk.f32.gmra.mrb[6].mxu1 %vm439_vm2, %v6042_v40  ;;  %7176 = vst [vmem:[#allocation8_spill] sm:$0xff] %v6220_v21  ;;  %7177 = vst [vmem:[#allocation9_spill] sm:$0xff] %v6224_v22  ;;  %v6232_v24 = vld [vmem:[#allocation2 + $0xaa] sm:$0xff]  ;;  %v6244_v27 = vld [vmem:[#allocation2 + $0xb2] sm:$0xff] }
  0x3b   : > { %5028 = vmatprep.mubr.msk.f32.mxu1 %vm439_vm2, %v6047_v41  ;;  %7178 = vst [vmem:[#allocation10_spill] sm:$0xff] %v6236_v25  ;;  %v6240_v26 = vld [vmem:[#allocation2 + $0x151] sm:$0xff]  ;;  %v6248_v28 = vld [vmem:[#allocation2 + $0xc2] sm:$0xff]  ;;  %v6252_v29 = vld [vmem:[#allocation2 + $0x159] sm:$0xff] }
  0x3c   : > { %5229 = vmatmul.mubr.msk.f32.gmra.mrb[8].mxu0 %vm439_vm2, %v6077_v50  ;;  %7179 = vst [vmem:[#allocation11_spill] sm:$0xff] %v6240_v26  ;;  %7180 = vst [vmem:[#allocation12_spill] sm:$0xff] %v6252_v29  ;;  %v6256_v30 = vld [vmem:[#allocation2 + $0x169] sm:$0xff]  ;;  %v6264_v32 = vld [vmem:[#allocation2 + $0xda] sm:$0xff] }
  0x3d   : > { %5231 = vmatprep.mubr.msk.f32.mxu0 %vm439_vm2, %v6085_v53  ;;  %7181 = vst [vmem:[#allocation13_spill] sm:$0xff] %v6256_v30  ;;  %v6260_v31 = vld [vmem:[#allocation2 + $0xca] sm:$0xff]  ;;  %v515_v35 = vld [vmem:[#allocation2] sm:$0xff]  ;;  %v6278_v43 = vld [vmem:[#allocation2 + $0xf2] sm:$0xff] }
  0x3e   : > { %5029 = vmatmul.mubr.msk.f32.gmra.mrb[8].mxu1 %vm439_vm2, %v6055_v42  ;;  %v6268_v34 = vld [vmem:[#allocation2 + $0x171] sm:$0xff]  ;;  %v516_v44 = vld [vmem:[#allocation2 + $0x8] sm:$0xff]  ;;  %v6287_v47 = vld [vmem:[#allocation2 + $0xfa] sm:$0xff] }
  0x3f   : > { %5031 = vmatprep.mubr.msk.f32.mxu1 %vm439_vm2, %v6061_v45  ;;  %7182 = vst [vmem:[#allocation14_spill] sm:$0xff] %v6268_v34  ;;  %v6283_v46 = vld [vmem:[#allocation2 + $0x18] sm:$0xff]  ;;  %v6292_v48 = vld [vmem:[%s7124_s3 + $0xc] sm:$0xf]  ;;  %v6301_v51 = vld [vmem:[#allocation2 + $0x20] sm:$0xff] }
  0x40   : > { %5232 = vmatmul.mubr.msk.f32.gmra.mrb[10].mxu0 %vm439_vm2, %v6095_v54  ;;  %7183 = vst [vmem:[#allocation15_spill] sm:$0xff] %v6283_v46  ;;  %v6295_v49 = vld [vmem:[#allocation2 + $0x10a] sm:$0xff]  ;;  %7184 = vst [vmem:[#allocation16_spill] sm:$0xff] %v6301_v51  ;;  %v6311_v60 = vld [vmem:[#allocation2 + $0x112] sm:$0xff] }
  0x41   : > { %5234 = vmatprep.mubr.msk.f32.mxu0 %vm439_vm2, %v6099_v55  ;;  %v6305_v52 = vld [vmem:[#allocation2 + $0x30] sm:$0xff]  ;;  %v6319_v61 = vld [vmem:[#allocation2 + $0x38] sm:$0xff]  ;;  %v6323_v4 = vld [vmem:[#allocation2 + $0x48] sm:$0xff] }
  0x42   : > { %5032 = vmatmul.mubr.msk.f32.gmra.mrb[10].mxu1 %vm439_vm2, %v6077_v50  ;;  %7185 = vst [vmem:[#allocation17_spill] sm:$0xff] %v6305_v52  ;;  %7186 = vst [vmem:[#allocation18_spill] sm:$0xff] %v6319_v61  ;;  %v6327_v6 = vld [vmem:[#allocation2 + $0x12a] sm:$0xff]  ;;  %v6331_v8 = vld [vmem:[#allocation2 + $0x13a] sm:$0xff] }
  0x43   : > { %5034 = vmatprep.mubr.msk.f32.mxu1 %vm439_vm2, %v6085_v53  ;;  %7187 = vst [vmem:[#allocation19_spill] sm:$0xff] %v6323_v4  ;;  %v6335_v10 = vld [vmem:[#allocation2 + $0x50] sm:$0xff] }
  0x44   : > { %5235 = vmatmul.mubr.msk.f32.gmra.mrb[12].mxu0 %vm439_vm2, %v6107_v56  ;;  %7188 = vst [vmem:[#allocation20_spill] sm:$0xff] %v6335_v10 }
  0x45   : > { %5237 = vmatprep.mubr.msk.f32.mxu0 %vm439_vm2, %v6111_v57 }
  0x46   : > { %5035 = vmatmul.mubr.msk.f32.gmra.mrb[12].mxu1 %vm439_vm2, %v6095_v54 }
  0x47   : > { %5037 = vmatprep.mubr.msk.f32.mxu1 %vm439_vm2, %v6099_v55 }
  0x48   : > { %5238 = vmatmul.mubr.msk.f32.gmra.mrb[14].mxu0 %vm439_vm2, %v6119_v58 }
  0x49   : > { %5266 = vmatprep.mubr.msk.f32.mxu0 %vm439_vm2, %v6123_v59 }
  0x4a   : > { %5038 = vmatmul.mubr.msk.f32.gmra.mrb[14].mxu1 %vm439_vm2, %v6107_v56 }
  0x4b   : > { %5040 = vmatprep.mubr.msk.f32.mxu1 %vm439_vm2, %v6111_v57 }
  0x4c   : > { %5267 = vmatmul.mubr.msk.f32.vlgmr.msra.gmra.mrb[0].mxu0 %vm439_vm2, %v6136_v62 }
  0x4d   : > { %5315 = vmatpush3.msk.msra.mxu0 %vm678_vm0, %v6021_v37  ;;  %5269 = vmatprep.mubr.msk.f32.mxu0 %vm439_vm2, %v6140_v63  ;;  %v6274_v37 = vld [vmem:[#allocation2 + $0xe2] sm:$0xff] }
  0x4e   : > { %5041 = vmatmul.mubr.msk.f32.gmra.mrb[16].mxu1 %vm439_vm2, %v6119_v58  ;;  %5364 = vmatprep.subr.msk.mxu0 %vm678_vm0, %v6150_v1 }
  0x4f   : > { %5043 = vmatprep.mubr.msk.f32.mxu1 %vm439_vm2, %v6154_v2 }
  0x50   : > { %5270 = vmatmul.mubr.msk.f32.gmra.mrb[2].mxu0 %vm439_vm2, %v6160_v3 }
  0x51   : > { %5272 = vmatprep.mubr.msk.f32.mxu0 %vm439_vm2, %v6164_v5 }
  0x52   : > { %5044 = vmatmul.mubr.msk.f32.gmra.mrb[18].mxu1 %vm439_vm2, %v6170_v7 }
  0x53   : > { %5046 = vmatprep.mubr.msk.f32.mxu1 %vm439_vm2, %v6174_v9  ;;  %v6401_v9 = vld [vmem:[#allocation2 + $0xc0] sm:$0xff] }
  0x54   : > { %5273 = vmatmul.mubr.msk.f32.gmra.mrb[4].mxu0 %vm439_vm2, %v6179_v11  ;;  %7200 = vst [vmem:[#allocation32_spill] sm:$0xff] %v6401_v9 }
  0x55   : > { %5275 = vmatprep.mubr.msk.f32.mxu0 %vm439_vm2, %v6183_v12 }
  0x56   : > { %5047 = vmatmul.mubr.msk.f32.gmra.mrb[20].mxu1 %vm439_vm2, %v6188_v13  ;;  %v6391_v13 = vld [vmem:[#allocation2 + $0x18a] sm:$0xff] }
  0x57   : > { %5049 = vmatprep.mubr.msk.f32.mxu1 %vm439_vm2, %v6192_v14  ;;  %v6387_v14 = vld [vmem:[#allocation2 + $0xa8] sm:$0xff]  ;;  %7198 = vst [vmem:[#allocation30_spill] sm:$0xff] %v6391_v13 }
  0x58   : > { %5276 = vmatmul.mubr.msk.f32.gmra.mrb[6].mxu0 %vm439_vm2, %v6196_v15  ;;  %7197 = vst [vmem:[#allocation29_spill] sm:$0xff] %v6387_v14 }
  0x59   : > { %5278 = vmatprep.mubr.msk.f32.mxu0 %vm439_vm2, %v6200_v16 }
  0x5a   : > { %5050 = vmatmul.mubr.msk.f32.gmra.mrb[22].mxu1 %vm439_vm2, %v6204_v17  ;;  %v6379_v17 = vld [vmem:[#allocation2 + $0x182] sm:$0xff] }
  0x5b   : > { %5052 = vmatprep.mubr.msk.f32.mxu1 %vm439_vm2, %v6208_v18  ;;  %v6375_v18 = vld [vmem:[#allocation2 + $0x172] sm:$0xff]  ;;  %7195 = vst [vmem:[#allocation27_spill] sm:$0xff] %v6379_v17 }
  0x5c   : > { %5279 = vmatmul.mubr.msk.f32.gmra.mrb[8].mxu0 %vm439_vm2, %v6212_v19  ;;  %7194 = vst [vmem:[#allocation26_spill] sm:$0xff] %v6375_v18 }
  0x5d   : > { %5281 = vmatprep.mubr.msk.f32.mxu0 %vm439_vm2, %v6216_v20 }
  0x5e   : > { %5053 = vmatmul.mubr.msk.f32.gmra.mrb[24].mxu1 %vm439_vm2, %v6220_v21  ;;  %v6371_v21 = vld [vmem:[#allocation2 + $0x90] sm:$0xff] }
  0x5f   : > { %5055 = vmatprep.mubr.msk.f32.mxu1 %vm439_vm2, %v6224_v22  ;;  %v6367_v22 = vld [vmem:[#allocation2 + $0x80] sm:$0xff]  ;;  %7193 = vst [vmem:[#allocation25_spill] sm:$0xff] %v6371_v21 }
  0x60   : > { %5282 = vmatmul.mubr.msk.f32.gmra.mrb[10].mxu0 %vm439_vm2, %v6228_v23  ;;  %7192 = vst [vmem:[#allocation24_spill] sm:$0xff] %v6367_v22 }
  0x61   : > { %5284 = vmatprep.mubr.msk.f32.mxu0 %vm439_vm2, %v6232_v24 }
  0x62   : > { %5056 = vmatmul.mubr.msk.f32.gmra.mrb[26].mxu1 %vm439_vm2, %v6236_v25  ;;  %v6363_v25 = vld [vmem:[#allocation2 + $0x16a] sm:$0xff] }
  0x63   : > { %5058 = vmatprep.mubr.msk.f32.mxu1 %vm439_vm2, %v6240_v26  ;;  %v6359_v26 = vld [vmem:[#allocation2 + $0x15a] sm:$0xff] }
  0x64   : > { %5285 = vmatmul.mubr.msk.f32.gmra.mrb[12].mxu0 %vm439_vm2, %v6244_v27 }
  0x65   : > { %5287 = vmatprep.mubr.msk.f32.mxu0 %vm439_vm2, %v6248_v28 }
  0x66   : > { %5059 = vmatmul.mubr.msk.f32.gmra.mrb[28].mxu1 %vm439_vm2, %v6252_v29  ;;  %v6355_v29 = vld [vmem:[#allocation2 + $0x78] sm:$0xff] }
  0x67   : > { %5061 = vmatprep.mubr.msk.f32.mxu1 %vm439_vm2, %v6256_v30  ;;  %v6351_v30 = vld [vmem:[#allocation2 + $0x68] sm:$0xff]  ;;  %7191 = vst [vmem:[#allocation23_spill] sm:$0xff] %v6355_v29 }
  0x68   : > { %5288 = vmatmul.mubr.msk.f32.gmra.mrb[14].mxu0 %vm439_vm2, %v6260_v31  ;;  %7190 = vst [vmem:[#allocation22_spill] sm:$0xff] %v6351_v30 }
  0x69   : > { %5290 = vmatprep.mubr.msk.f32.mxu0 %vm439_vm2, %v6264_v32 }
  0x6a   : > { %5062 = vmatmul.mubr.msk.f32.gmra.mrb[30].mxu1 %vm439_vm2, %v6268_v34  ;;  %v6347_v34 = vld [vmem:[#allocation2 + $0x152] sm:$0xff] }
  0x6b   : > { %5066 = vmatprep.mubr.msk.f32.mxu1 %vm439_vm2, %v515_v35  ;;  %v6339_v35 = vld [vmem:[#allocation2 + $0x60] sm:$0xff] }
  0x6c   : > { %5291 = vmatmul.mubr.msk.f32.gmra.mrb[16].mxu0 %vm439_vm2, %v6274_v37  ;;  %7189 = vst [vmem:[#allocation21_spill] sm:$0xff] %v6339_v35 }
  0x6d   : > { %5293 = vmatprep.mubr.msk.f32.mxu0 %vm439_vm2, %v6278_v43 }
  0x6e   : > { %5067 = vmatmul.mubr.msk.f32.vlgmr.msra.gmra.mrb[0].mxu1 %vm439_vm2, %v516_v44  ;;  %v6343_v44 = vld [vmem:[#allocation2 + $0x142] sm:$0xff] }
  0x6f   : > { %5115 = vmatpush3.msk.msra.mxu1 %vm678_vm0, %v6031_v39  ;;  %5069 = vmatprep.mubr.msk.f32.mxu1 %vm439_vm2, %v6283_v46  ;;  %v6315_v39 = vld [vmem:[#allocation2 + $0x122] sm:$0xff]  ;;  %v6397_v46 = vld [vmem:[#allocation2 + $0xb0] sm:$0xff] }
  0x70   : > { %5294 = vmatmul.mubr.msk.f32.gmra.mrb[18].mxu0 %vm439_vm2, %v6287_v47  ;;  %5164 = vmatprep.subr.msk.mxu1 %vm678_vm0, %v6292_v48  ;;  %7199 = vst [vmem:[#allocation31_spill] sm:$0xff] %v6397_v46 }
  0x71   : > { %5296 = vmatprep.mubr.msk.f32.mxu0 %vm439_vm2, %v6295_v49 }
  0x72   : > { %5070 = vmatmul.mubr.msk.f32.gmra.mrb[2].mxu1 %vm439_vm2, %v6301_v51  ;;  %v6383_v51 = vld [vmem:[#allocation2 + $0x98] sm:$0xff] }
  0x73   : > { %5072 = vmatprep.mubr.msk.f32.mxu1 %vm439_vm2, %v6305_v52  ;;  %7196 = vst [vmem:[#allocation28_spill] sm:$0xff] %v6383_v51 }
  0x74   : > { %5297 = vmatmul.mubr.msk.f32.gmra.mrb[20].mxu0 %vm439_vm2, %v6311_v60 }
  0x75   : > { %5299 = vmatprep.mubr.msk.f32.mxu0 %vm439_vm2, %v6315_v39 }
  0x76   : > { %5073 = vmatmul.mubr.msk.f32.gmra.mrb[4].mxu1 %vm439_vm2, %v6319_v61 }
  0x77   : > { %5075 = vmatprep.mubr.msk.f32.mxu1 %vm439_vm2, %v6323_v4 }
  0x78   : > { %5300 = vmatmul.mubr.msk.f32.gmra.mrb[22].mxu0 %vm439_vm2, %v6327_v6 }
  0x79   : > { %5302 = vmatprep.mubr.msk.f32.mxu0 %vm439_vm2, %v6331_v8 }
  0x7a   : > { %5076 = vmatmul.mubr.msk.f32.gmra.mrb[6].mxu1 %vm439_vm2, %v6335_v10 }
  0x7b   : > { %5078 = vmatprep.mubr.msk.f32.mxu1 %vm439_vm2, %v6339_v35 }
  0x7c   : > { %5303 = vmatmul.mubr.msk.f32.gmra.mrb[24].mxu0 %vm439_vm2, %v6343_v44 }
  0x7d   : > { %5305 = vmatprep.mubr.msk.f32.mxu0 %vm439_vm2, %v6347_v34 }
  0x7e   : > { %5079 = vmatmul.mubr.msk.f32.gmra.mrb[8].mxu1 %vm439_vm2, %v6351_v30 }
  0x7f   : > { %5081 = vmatprep.mubr.msk.f32.mxu1 %vm439_vm2, %v6355_v29 }
  0x80   : > { %5306 = vmatmul.mubr.msk.f32.gmra.mrb[26].mxu0 %vm439_vm2, %v6359_v26 }
  0x81   : > { %5308 = vmatprep.mubr.msk.f32.mxu0 %vm439_vm2, %v6363_v25 }
  0x82   : > { %5082 = vmatmul.mubr.msk.f32.gmra.mrb[10].mxu1 %vm439_vm2, %v6367_v22 }
  0x83   : > { %5084 = vmatprep.mubr.msk.f32.mxu1 %vm439_vm2, %v6371_v21 }
  0x84   : > { %5309 = vmatmul.mubr.msk.f32.gmra.mrb[28].mxu0 %vm439_vm2, %v6375_v18  ;;  %v6414_v18 = vld [vmem:[%s7124_s3 + $0x20] sm:$0xf] }
  0x85   : > { %5311 = vmatprep.mubr.msk.f32.mxu0 %vm439_vm2, %v6379_v17  ;;  %v6409_v17 = vld [vmem:[#allocation2 + $0xc8] sm:$0xff] }
  0x86   : > { %5085 = vmatmul.mubr.msk.f32.gmra.mrb[12].mxu1 %vm439_vm2, %v6383_v51 }
  0x87   : > { %5087 = vmatprep.mubr.msk.f32.mxu1 %vm439_vm2, %v6387_v14 }
  0x88   : > { %5312 = vmatmul.mubr.msk.f32.gmra.mrb[30].mxu0 %vm439_vm2, %v6391_v13  ;;  %v6418_v13 = vld [vmem:[#allocation2 + $0xd8] sm:$0xff] }
  0x89   : > { %5316 = vmatprep.mubr.msk.f32.mxu0 %vm439_vm2, %v6305_v52  ;;  %7201 = vst [vmem:[#allocation33_spill] sm:$0xff] %v6418_v13  ;;  %v6430_v52 = vld [vmem:[#allocation2 + $0xe0] sm:$0xff] }
  0x8a   : > { %5088 = vmatmul.mubr.msk.f32.gmra.mrb[14].mxu1 %vm439_vm2, %v6397_v46 }
  0x8b   : > { %5090 = vmatprep.mubr.msk.f32.mxu1 %vm439_vm2, %v6401_v9 }
  0x8c   : > { %5317 = vmatmul.mubr.msk.f32.vlgmr.msra.gmra.mrb[0].mxu0 %vm439_vm2, %v6319_v61  ;;  %v6434_v61 = vld [vmem:[#allocation2 + $0xf0] sm:$0xff] }
  0x8d   : > { %5365 = vmatpush3.msk.msra.mxu0 %vm678_vm0, %v6150_v1  ;;  %5319 = vmatprep.mubr.msk.f32.mxu0 %vm439_vm2, %v6323_v4  ;;  %v6442_v1 = vld [vmem:[#allocation2 + $0xf8] sm:$0xff]  ;;  %v6446_v4 = vld [vmem:[#allocation2 + $0x108] sm:$0xff] }
  0x8e   : > { %5091 = vmatmul.mubr.msk.f32.gmra.mrb[16].mxu1 %vm439_vm2, %v6409_v17  ;;  %5414 = vmatprep.subr.msk.mxu0 %vm678_vm0, %v6414_v18 }
  0x8f   : > { %5093 = vmatprep.mubr.msk.f32.mxu1 %vm439_vm2, %v6418_v13 }
  0x90   : > { %5320 = vmatmul.mubr.msk.f32.gmra.mrb[2].mxu0 %vm439_vm2, %v6335_v10  ;;  %v6458_v10 = vld [vmem:[#allocation2 + $0x120] sm:$0xff] }
  0x91   : > { %5322 = vmatprep.mubr.msk.f32.mxu0 %vm439_vm2, %v6339_v35  ;;  %v6454_v35 = vld [vmem:[#allocation2 + $0x110] sm:$0xff] }
  0x92   : > { %5094 = vmatmul.mubr.msk.f32.gmra.mrb[18].mxu1 %vm439_vm2, %v6430_v52 }
  0x93   : > { %5096 = vmatprep.mubr.msk.f32.mxu1 %vm439_vm2, %v6434_v61 }
  0x94   : > { %5323 = vmatmul.mubr.msk.f32.gmra.mrb[4].mxu0 %vm439_vm2, %v6351_v30  ;;  %v6470_v30 = vld [vmem:[#allocation2 + $0x138] sm:$0xff] }
  0x95   : > { %5325 = vmatprep.mubr.msk.f32.mxu0 %vm439_vm2, %v6355_v29  ;;  %v6466_v29 = vld [vmem:[#allocation2 + $0x128] sm:$0xff] }
  0x96   : > { %5097 = vmatmul.mubr.msk.f32.gmra.mrb[20].mxu1 %vm439_vm2, %v6442_v1 }
  0x97   : > { %5099 = vmatprep.mubr.msk.f32.mxu1 %vm439_vm2, %v6446_v4 }
  0x98   : > { %5326 = vmatmul.mubr.msk.f32.gmra.mrb[6].mxu0 %vm439_vm2, %v6367_v22  ;;  %v6482_v22 = vld [vmem:[#allocation2 + $0x150] sm:$0xff] }
  0x99   : > { %5328 = vmatprep.mubr.msk.f32.mxu0 %vm439_vm2, %v6371_v21  ;;  %v6478_v21 = vld [vmem:[#allocation2 + $0x140] sm:$0xff] }
  0x9a   : > { %5100 = vmatmul.mubr.msk.f32.gmra.mrb[22].mxu1 %vm439_vm2, %v6454_v35 }
  0x9b   : > { %5102 = vmatprep.mubr.msk.f32.mxu1 %vm439_vm2, %v6458_v10 }
  0x9c   : > { %5329 = vmatmul.mubr.msk.f32.gmra.mrb[8].mxu0 %vm439_vm2, %v6383_v51  ;;  %v6494_v51 = vld [vmem:[#allocation2 + $0x168] sm:$0xff] }
  0x9d   : > { %5331 = vmatprep.mubr.msk.f32.mxu0 %vm439_vm2, %v6387_v14  ;;  %v6490_v14 = vld [vmem:[#allocation2 + $0x158] sm:$0xff] }
  0x9e   : > { %5103 = vmatmul.mubr.msk.f32.gmra.mrb[24].mxu1 %vm439_vm2, %v6466_v29 }
  0x9f   : > { %5105 = vmatprep.mubr.msk.f32.mxu1 %vm439_vm2, %v6470_v30 }
  0xa0   : > { %5332 = vmatmul.mubr.msk.f32.gmra.mrb[10].mxu0 %vm439_vm2, %v6397_v46  ;;  %v1231_v46 = vld [vmem:[#allocation2 + $0x2] sm:$0xff] }
  0xa1   : > { %5334 = vmatprep.mubr.msk.f32.mxu0 %vm439_vm2, %v6401_v9  ;;  %v6502_v9 = vld [vmem:[#allocation2 + $0x170] sm:$0xff] }
  0xa2   : > { %5106 = vmatmul.mubr.msk.f32.gmra.mrb[26].mxu1 %vm439_vm2, %v6478_v21 }
  0xa3   : > { %5108 = vmatprep.mubr.msk.f32.mxu1 %vm439_vm2, %v6482_v22 }
  0xa4   : > { %5335 = vmatmul.mubr.msk.f32.gmra.mrb[12].mxu0 %vm439_vm2, %v6409_v17 }
  0xa5   : > { %5337 = vmatprep.mubr.msk.f32.mxu0 %vm439_vm2, %v6418_v13  ;;  %v1232_v13 = vld [vmem:[#allocation2 + $0xa] sm:$0xff] }
  0xa6   : > { %5109 = vmatmul.mubr.msk.f32.gmra.mrb[28].mxu1 %vm439_vm2, %v6490_v14 }
  0xa7   : > { %5111 = vmatprep.mubr.msk.f32.mxu1 %vm439_vm2, %v6494_v51 }
  0xa8   : > { %5338 = vmatmul.mubr.msk.f32.gmra.mrb[14].mxu0 %vm439_vm2, %v6430_v52 }
  0xa9   : > { %5340 = vmatprep.mubr.msk.f32.mxu0 %vm439_vm2, %v6434_v61 }
  0xaa   : > { %5112 = vmatmul.mubr.msk.f32.gmra.mrb[30].mxu1 %vm439_vm2, %v6502_v9 }
  0xab   : > { %5116 = vmatprep.mubr.msk.f32.mxu1 %vm439_vm2, %v1231_v46  ;;  %v2823_v46 = vld [vmem:[#allocation2 + $0x1a0] sm:$0xff] }
  0xac   : > { %5341 = vmatmul.mubr.msk.f32.gmra.mrb[16].mxu0 %vm439_vm2, %v6442_v1 }
  0xad   : > { %5343 = vmatprep.mubr.msk.f32.mxu0 %vm439_vm2, %v6446_v4 }
  0xae   : > { %5117 = vmatmul.mubr.msk.f32.vlgmr.msra.gmra.mrb[0].mxu1 %vm439_vm2, %v1232_v13  ;;  %v2822_v13 = vld [vmem:[#allocation2 + $0x198] sm:$0xff] }
  0xaf   : > { %5165 = vmatpush3.msk.msra.mxu1 %vm678_vm0, %v6292_v48  ;;  %5119 = vmatprep.mubr.msk.f32.mxu1 %vm439_vm2, %v6123_v59  ;;  %v6552_v59 = vld [vmem:[#allocation2 + $0x180] sm:$0xff]  ;;  %v7218_v48 = vld [vmem:[#allocation11_spill] sm:$0xff] }
  0xb0   : > { %5344 = vmatmul.mubr.msk.f32.gmra.mrb[18].mxu0 %vm439_vm2, %v6454_v35  ;;  %5464 = vmatprep.subr.msk.mxu1 %vm678_vm0, %v5887_v0 }
  0xb1   : > { %5346 = vmatprep.mubr.msk.f32.mxu0 %vm439_vm2, %v6458_v10 }
  0xb2   : > { %5120 = vmatmul.mubr.msk.f32.gmra.mrb[2].mxu1 %vm439_vm2, %v6136_v62  ;;  %v6560_v62 = vld [vmem:[#allocation2 + $0x188] sm:$0xff] }
  0xb3   : > { %5122 = vmatprep.mubr.msk.f32.mxu1 %vm439_vm2, %v6140_v63 }
  0xb4   : > { %5347 = vmatmul.mubr.msk.f32.gmra.mrb[20].mxu0 %vm439_vm2, %v6466_v29 }
  0xb5   : > { %5349 = vmatprep.mubr.msk.f32.mxu0 %vm439_vm2, %v6470_v30 }
  0xb6   : > { %5123 = vmatmul.mubr.msk.f32.gmra.mrb[4].mxu1 %vm439_vm2, %v6160_v3 }
  0xb7   : > { %5125 = vmatprep.mubr.msk.f32.mxu1 %vm439_vm2, %v6164_v5 }
  0xb8   : > { %5350 = vmatmul.mubr.msk.f32.gmra.mrb[22].mxu0 %vm439_vm2, %v6478_v21 }
  0xb9   : > { %5352 = vmatprep.mubr.msk.f32.mxu0 %vm439_vm2, %v6482_v22 }
  0xba   : > { %5126 = vmatmul.mubr.msk.f32.gmra.mrb[6].mxu1 %vm439_vm2, %v6179_v11 }
  0xbb   : > { %5128 = vmatprep.mubr.msk.f32.mxu1 %vm439_vm2, %v6183_v12 }
  0xbc   : > { %5353 = vmatmul.mubr.msk.f32.gmra.mrb[24].mxu0 %vm439_vm2, %v6490_v14 }
  0xbd   : > { %5355 = vmatprep.mubr.msk.f32.mxu0 %vm439_vm2, %v6494_v51 }
  0xbe   : > { %5129 = vmatmul.mubr.msk.f32.gmra.mrb[8].mxu1 %vm439_vm2, %v6196_v15 }
  0xbf   : > { %5131 = vmatprep.mubr.msk.f32.mxu1 %vm439_vm2, %v6200_v16 }
  0xc0   : > { %5356 = vmatmul.mubr.msk.f32.gmra.mrb[26].mxu0 %vm439_vm2, %v6502_v9 }
  0xc1   : > { %5358 = vmatprep.mubr.msk.f32.mxu0 %vm439_vm2, %v6552_v59 }
  0xc2   : > { %5132 = vmatmul.mubr.msk.f32.gmra.mrb[10].mxu1 %vm439_vm2, %v6212_v19 }
  0xc3   : > { %5134 = vmatprep.mubr.msk.f32.mxu1 %vm439_vm2, %v6216_v20 }
  0xc4   : > { %5359 = vmatmul.mubr.msk.f32.gmra.mrb[28].mxu0 %vm439_vm2, %v6560_v62 }
  0xc5   : > { %5361 = vmatprep.mubr.msk.f32.mxu0 %vm439_vm2, %v2822_v13  ;;  %v7219_v13 = vld [vmem:[#allocation22_spill] sm:$0xff] }
  0xc6   : > { %5135 = vmatmul.mubr.msk.f32.gmra.mrb[12].mxu1 %vm439_vm2, %v6228_v23 }
  0xc7   : > { %5137 = vmatprep.mubr.msk.f32.mxu1 %vm439_vm2, %v6232_v24 }
  0xc8   : > { %5362 = vmatmul.mubr.msk.f32.gmra.mrb[30].mxu0 %vm439_vm2, %v2823_v46  ;;  %v7220_v46 = vld [vmem:[#allocation23_spill] sm:$0xff] }
  0xc9   : > { %5366 = vmatprep.mubr.msk.f32.mxu0 %vm439_vm2, %v6010_v33  ;;  %v7202_v33 = vld [vmem:[#allocation3_spill] sm:$0xff] }
  0xca   : > { %5138 = vmatmul.mubr.msk.f32.gmra.mrb[14].mxu1 %vm439_vm2, %v6244_v27 }
  0xcb   : > { %5140 = vmatprep.mubr.msk.f32.mxu1 %vm439_vm2, %v6248_v28 }
  0xcc   : > { %5367 = vmatmul.mubr.msk.f32.vlgmr.msra.gmra.mrb[0].mxu0 %vm439_vm2, %v6016_v36  ;;  %v7203_v36 = vld [vmem:[#allocation26_spill] sm:$0xff] }
  0xcd   : > { %5415 = vmatpush3.msk.msra.mxu0 %vm678_vm0, %v6414_v18  ;;  %5369 = vmatprep.mubr.msk.f32.mxu0 %vm439_vm2, %v6026_v38  ;;  %v7204_v38 = vld [vmem:[#allocation15_spill] sm:$0xff]  ;;  %v7217_v18 = vld [vmem:[#allocation10_spill] sm:$0xff] }
  0xce   : > { %5141 = vmatmul.mubr.msk.f32.gmra.mrb[16].mxu1 %vm439_vm2, %v6260_v31 }
  0xcf   : > { %5143 = vmatprep.mubr.msk.f32.mxu1 %vm439_vm2, %v6264_v32 }
  0xd0   : > { %5370 = vmatmul.mubr.msk.f32.gmra.mrb[2].mxu0 %vm439_vm2, %v6042_v40  ;;  %v7205_v40 = vld [vmem:[#allocation4_spill] sm:$0xff] }
  0xd1   : > { %5372 = vmatprep.mubr.msk.f32.mxu0 %vm439_vm2, %v6047_v41  ;;  %v7206_v41 = vld [vmem:[#allocation5_spill] sm:$0xff] }
  0xd2   : > { %5144 = vmatmul.mubr.msk.f32.gmra.mrb[18].mxu1 %vm439_vm2, %v6274_v37 }
  0xd3   : > { %5146 = vmatprep.mubr.msk.f32.mxu1 %vm439_vm2, %v6278_v43 }
  0xd4   : > { %5373 = vmatmul.mubr.msk.f32.gmra.mrb[4].mxu0 %vm439_vm2, %v6055_v42  ;;  %v7207_v42 = vld [vmem:[#allocation16_spill] sm:$0xff] }
  0xd5   : > { %5375 = vmatprep.mubr.msk.f32.mxu0 %vm439_vm2, %v6061_v45  ;;  %v7208_v45 = vld [vmem:[#allocation17_spill] sm:$0xff] }
  0xd6   : > { %5147 = vmatmul.mubr.msk.f32.gmra.mrb[20].mxu1 %vm439_vm2, %v6287_v47 }
  0xd7   : > { %5149 = vmatprep.mubr.msk.f32.mxu1 %vm439_vm2, %v6295_v49 }
  0xd8   : > { %5376 = vmatmul.mubr.msk.f32.gmra.mrb[6].mxu0 %vm439_vm2, %v6077_v50  ;;  %v7209_v50 = vld [vmem:[#allocation6_spill] sm:$0xff] }
  0xd9   : > { %5378 = vmatprep.mubr.msk.f32.mxu0 %vm439_vm2, %v6085_v53  ;;  %v7210_v53 = vld [vmem:[#allocation7_spill] sm:$0xff] }
  0xda   : > { %5150 = vmatmul.mubr.msk.f32.gmra.mrb[22].mxu1 %vm439_vm2, %v6311_v60 }
  0xdb   : > { %5152 = vmatprep.mubr.msk.f32.mxu1 %vm439_vm2, %v6315_v39 }
  0xdc   : > { %5379 = vmatmul.mubr.msk.f32.gmra.mrb[8].mxu0 %vm439_vm2, %v6095_v54  ;;  %v7211_v54 = vld [vmem:[#allocation18_spill] sm:$0xff] }
  0xdd   : > { %5381 = vmatprep.mubr.msk.f32.mxu0 %vm439_vm2, %v6099_v55  ;;  %v7212_v55 = vld [vmem:[#allocation19_spill] sm:$0xff] }
  0xde   : > { %5153 = vmatmul.mubr.msk.f32.gmra.mrb[24].mxu1 %vm439_vm2, %v6327_v6 }
  0xdf   : > { %5155 = vmatprep.mubr.msk.f32.mxu1 %vm439_vm2, %v6331_v8 }
  0xe0   : > { %5382 = vmatmul.mubr.msk.f32.gmra.mrb[10].mxu0 %vm439_vm2, %v6107_v56  ;;  %v7213_v56 = vld [vmem:[#allocation8_spill] sm:$0xff] }
  0xe1   : > { %5384 = vmatprep.mubr.msk.f32.mxu0 %vm439_vm2, %v6111_v57  ;;  %v7214_v57 = vld [vmem:[#allocation9_spill] sm:$0xff] }
  0xe2   : > { %5156 = vmatmul.mubr.msk.f32.gmra.mrb[26].mxu1 %vm439_vm2, %v6343_v44 }
  0xe3   : > { %5158 = vmatprep.mubr.msk.f32.mxu1 %vm439_vm2, %v6347_v34 }
  0xe4   : > { %5385 = vmatmul.mubr.msk.f32.gmra.mrb[12].mxu0 %vm439_vm2, %v6119_v58  ;;  %v7216_v58 = vld [vmem:[#allocation21_spill] sm:$0xff] }
  0xe5   : > { %5387 = vmatprep.mubr.msk.f32.mxu0 %vm439_vm2, %v6154_v2 }
  0xe6   : > { %5159 = vmatmul.mubr.msk.f32.gmra.mrb[28].mxu1 %vm439_vm2, %v6359_v26 }
  0xe7   : > { %5161 = vmatprep.mubr.msk.f32.mxu1 %vm439_vm2, %v6363_v25 }
  0xe8   : > { %5388 = vmatmul.mubr.msk.f32.gmra.mrb[14].mxu0 %vm439_vm2, %v6170_v7 }
  0xe9   : > { %5390 = vmatprep.mubr.msk.f32.mxu0 %vm439_vm2, %v7202_v33 }
  0xea   : > { %5162 = vmatmul.mubr.msk.f32.gmra.mrb[30].mxu1 %vm439_vm2, %v7203_v36 }
  0xeb   : > { %5166 = vmatprep.mubr.msk.f32.mxu1 %vm439_vm2, %v7204_v38  ;;  %v7221_v38 = vld [vmem:[#allocation12_spill] sm:$0xff] }
  0xec   : > { %5391 = vmatmul.mubr.msk.f32.gmra.mrb[16].mxu0 %vm439_vm2, %v7205_v40 }
  0xed   : > { %5393 = vmatprep.mubr.msk.f32.mxu0 %vm439_vm2, %v7206_v41 }
  0xee   : > { %5167 = vmatmul.mubr.msk.f32.vlgmr.msra.gmra.mrb[0].mxu1 %vm439_vm2, %v7207_v42  ;;  %v7222_v42 = vld [vmem:[#allocation13_spill] sm:$0xff] }
  0xef   : > { %5465 = vmatpush3.msk.msra.mxu1 %vm678_vm0, %v5887_v0  ;;  %5169 = vmatprep.mubr.msk.f32.mxu1 %vm439_vm2, %v7208_v45  ;;  %v7215_v0 = vld [vmem:[#allocation20_spill] sm:$0xff] }
  0xf0   : > { %5394 = vmatmul.mubr.msk.f32.gmra.mrb[18].mxu0 %vm439_vm2, %v7209_v50  ;;  %v7223_v45 = vld [vmem:[#allocation24_spill] sm:$0xff] }
  0xf1   : > { %5396 = vmatprep.mubr.msk.f32.mxu0 %vm439_vm2, %v7210_v53 }
  0xf2   : > { %5170 = vmatmul.mubr.msk.f32.gmra.mrb[2].mxu1 %vm439_vm2, %v7211_v54  ;;  %v6686_v54 = vld [vmem:[#allocation2 + $0x181] sm:$0xff] }
  0xf3   : > { %5172 = vmatprep.mubr.msk.f32.mxu1 %vm439_vm2, %v7212_v55  ;;  %v7224_v55 = vld [vmem:[#allocation25_spill] sm:$0xff] }
  0xf4   : > { %5397 = vmatmul.mubr.msk.f32.gmra.mrb[20].mxu0 %vm439_vm2, %v7213_v56 }
  0xf5   : > { %5399 = vmatprep.mubr.msk.f32.mxu0 %vm439_vm2, %v7214_v57 }
  0xf6   : > { %5173 = vmatmul.mubr.msk.f32.gmra.mrb[4].mxu1 %vm439_vm2, %v7215_v0  ;;  %v7225_v0 = vld [vmem:[#allocation14_spill] sm:$0xff] }
  0xf7   : > { %5175 = vmatprep.mubr.msk.f32.mxu1 %vm439_vm2, %v7216_v58  ;;  %v6694_v58 = vld [vmem:[#allocation2 + $0x189] sm:$0xff] }
  0xf8   : > { %5400 = vmatmul.mubr.msk.f32.gmra.mrb[22].mxu0 %vm439_vm2, %v7217_v18 }
  0xf9   : > { %5402 = vmatprep.mubr.msk.f32.mxu0 %vm439_vm2, %v7218_v48 }
  0xfa   : > { %5176 = vmatmul.mubr.msk.f32.gmra.mrb[6].mxu1 %vm439_vm2, %v7219_v13  ;;  %v7226_v13 = vld [vmem:[#allocation28_spill] sm:$0xff] }
  0xfb   : > { %5178 = vmatprep.mubr.msk.f32.mxu1 %vm439_vm2, %v7220_v46  ;;  %v3212_v46 = vld [vmem:[#allocation2 + $0x199] sm:$0xff] }
  0xfc   : > { %5403 = vmatmul.mubr.msk.f32.gmra.mrb[24].mxu0 %vm439_vm2, %v7221_v38 }
  0xfd   : > { %5405 = vmatprep.mubr.msk.f32.mxu0 %vm439_vm2, %v7222_v42  ;;  %v7227_v42 = vld [vmem:[#allocation29_spill] sm:$0xff] }
  0xfe   : > { %5179 = vmatmul.mubr.msk.f32.gmra.mrb[8].mxu1 %vm439_vm2, %v7223_v45  ;;  %v3213_v45 = vld [vmem:[#allocation2 + $0x1a1] sm:$0xff] }
  0xff   : > { %5181 = vmatprep.mubr.msk.f32.mxu1 %vm439_vm2, %v7224_v55  ;;  %v7228_v55 = vld [vmem:[#allocation31_spill] sm:$0xff] }
 0x100   : > { %5406 = vmatmul.mubr.msk.f32.gmra.mrb[26].mxu0 %vm439_vm2, %v7225_v0  ;;  %v7229_v0 = vld [vmem:[#allocation32_spill] sm:$0xff] }
 0x101   : > { %5408 = vmatprep.mubr.msk.f32.mxu0 %vm439_vm2, %v6686_v54 }
 0x102   : > { %5182 = vmatmul.mubr.msk.f32.gmra.mrb[10].mxu1 %vm439_vm2, %v7226_v13 }
 0x103   : > { %5184 = vmatprep.mubr.msk.f32.mxu1 %vm439_vm2, %v7227_v42  ;;  %v7230_v42 = vld [vmem:[#allocation33_spill] sm:$0xff] }
 0x104   : > { %5409 = vmatmul.mubr.msk.f32.gmra.mrb[28].mxu0 %vm439_vm2, %v6694_v58 }
 0x105   : > { %5411 = vmatprep.mubr.msk.f32.mxu0 %vm439_vm2, %v3212_v46 }
 0x106   : > { %5185 = vmatmul.mubr.msk.f32.gmra.mrb[12].mxu1 %vm439_vm2, %v7228_v55 }
 0x107   : > { %5187 = vmatprep.mubr.msk.f32.mxu1 %vm439_vm2, %v7229_v0 }
 0x108   : > { %5412 = vmatmul.mubr.msk.f32.gmra.mrb[30].mxu0 %vm439_vm2, %v3213_v45 }
 0x109   : > { %5416 = vmatprep.mubr.msk.f32.mxu0 %vm439_vm2, %v6140_v63  ;;  %v7231_v63 = vld [vmem:[#allocation27_spill] sm:$0xff] }
 0x10a   : > { %5188 = vmatmul.mubr.msk.f32.gmra.mrb[14].mxu1 %vm439_vm2, %v6409_v17 }
 0x10b   : > { %5190 = vmatprep.mubr.msk.f32.mxu1 %vm439_vm2, %v7230_v42 }
 0x10c   : > { %5417 = vmatmul.mubr.msk.f32.vlgmr.msra.gmra.mrb[0].mxu0 %vm439_vm2, %v6160_v3  ;;  %v7232_v3 = vld [vmem:[#allocation13_spill] sm:$0xff] }
 0x10d   : > { %5419 = vmatprep.mubr.msk.f32.mxu0 %vm439_vm2, %v6164_v5  ;;  %v7233_v5 = vld [vmem:[#allocation30_spill] sm:$0xff] }
 0x10e   : > { %5191 = vmatmul.mubr.msk.f32.gmra.mrb[16].mxu1 %vm439_vm2, %v6430_v52 }
 0x10f   : > { %5193 = vmatprep.mubr.msk.f32.mxu1 %vm439_vm2, %v6434_v61 }
 0x110   : > { %5420 = vmatmul.mubr.msk.f32.gmra.mrb[2].mxu0 %vm439_vm2, %v6179_v11 }
 0x111   : > { %5422 = vmatprep.mubr.msk.f32.mxu0 %vm439_vm2, %v6183_v12 }
 0x112   : > { %5194 = vmatmul.mubr.msk.f32.gmra.mrb[18].mxu1 %vm439_vm2, %v6442_v1 }
 0x113   : > { %5196 = vmatprep.mubr.msk.f32.mxu1 %vm439_vm2, %v6446_v4 }
 0x114   : > { %5423 = vmatmul.mubr.msk.f32.gmra.mrb[4].mxu0 %vm439_vm2, %v6196_v15 }
 0x115   : > { %5425 = vmatprep.mubr.msk.f32.mxu0 %vm439_vm2, %v6200_v16 }
 0x116   : > { %5197 = vmatmul.mubr.msk.f32.gmra.mrb[20].mxu1 %vm439_vm2, %v6454_v35 }
 0x117   : > { %5199 = vmatprep.mubr.msk.f32.mxu1 %vm439_vm2, %v6458_v10 }
 0x118   : > { %5426 = vmatmul.mubr.msk.f32.gmra.mrb[6].mxu0 %vm439_vm2, %v6212_v19 }
 0x119   : > { %5428 = vmatprep.mubr.msk.f32.mxu0 %vm439_vm2, %v6216_v20 }
 0x11a   : > { %5200 = vmatmul.mubr.msk.f32.gmra.mrb[22].mxu1 %vm439_vm2, %v6466_v29 }
 0x11b   : > { %5202 = vmatprep.mubr.msk.f32.mxu1 %vm439_vm2, %v6470_v30  ;;  %v6851_v30 = vld [vmem:[%s7125_s4] ss:$0 sm:$0xff] }
 0x11c   : > { %5429 = vmatmul.mubr.msk.f32.gmra.mrb[8].mxu0 %vm439_vm2, %v6228_v23 }
 0x11d   : > { %5431 = vmatprep.mubr.msk.f32.mxu0 %vm439_vm2, %v6232_v24 }
 0x11e   : > { %5203 = vmatmul.mubr.msk.f32.gmra.mrb[24].mxu1 %vm439_vm2, %v6478_v21 }
 0x11f   : > { %5205 = vmatprep.mubr.msk.f32.mxu1 %vm439_vm2, %v6482_v22 }
 0x120   : > { %5432 = vmatmul.mubr.msk.f32.gmra.mrb[10].mxu0 %vm439_vm2, %v6244_v27 }
 0x121   : > { %5434 = vmatprep.mubr.msk.f32.mxu0 %vm439_vm2, %v6248_v28 }
 0x122   : > { %5206 = vmatmul.mubr.msk.f32.gmra.mrb[26].mxu1 %vm439_vm2, %v6490_v14 }
 0x123   : > { %5208 = vmatprep.mubr.msk.f32.mxu1 %vm439_vm2, %v6494_v51 }
 0x124   : > { %5435 = vmatmul.mubr.msk.f32.gmra.mrb[12].mxu0 %vm439_vm2, %v6260_v31 }
 0x125   : > { %5437 = vmatprep.mubr.msk.f32.mxu0 %vm439_vm2, %v6264_v32 }
 0x126   : > { %5209 = vmatmul.mubr.msk.f32.gmra.mrb[28].mxu1 %vm439_vm2, %v6502_v9  ;;  %v7234_v9 = vld [vmem:[#allocation14_spill] sm:$0xff] }
 0x127   : > { %5211 = vmatprep.mubr.msk.f32.mxu1 %vm439_vm2, %v6552_v59 }
 0x128   : > { %5438 = vmatmul.mubr.msk.f32.gmra.mrb[14].mxu0 %vm439_vm2, %v6274_v37 }
 0x129   : > { %5440 = vmatprep.mubr.msk.f32.mxu0 %vm439_vm2, %v6278_v43 }
 0x12a   : > { %5212 = vmatmul.mubr.msk.f32.gmra.mrb[30].mxu1 %vm439_vm2, %v6560_v62 }
 0x12b   : > { %5240 = vmatprep.mubr.msk.f32.mxu1 %vm439_vm2, %v6154_v2  ;;  %v3602_v2 = vld [vmem:[#allocation2 + $0x19a] sm:$0xff] }
 0x12c   : > { %5441 = vmatmul.mubr.msk.f32.gmra.mrb[16].mxu0 %vm439_vm2, %v6287_v47 }
 0x12d   : > { %5443 = vmatprep.mubr.msk.f32.mxu0 %vm439_vm2, %v6295_v49 }
 0x12e   : > { %5241 = vmatmul.mubr.msk.f32.vlgmr.msra.gmra.mrb[16].mxu1 %vm439_vm2, %v6170_v7  ;;  %v3603_v7 = vld [vmem:[#allocation2 + $0x1a2] sm:$0xff] }
 0x12f   : > { %5243 = vmatprep.mubr.msk.f32.mxu1 %vm439_vm2, %v7202_v33 }
 0x130   : > { %5444 = vmatmul.mubr.msk.f32.gmra.mrb[18].mxu0 %vm439_vm2, %v6311_v60 }
 0x131   : > { %5446 = vmatprep.mubr.msk.f32.mxu0 %vm439_vm2, %v6315_v39 }
 0x132   : > { %5244 = vmatmul.mubr.msk.f32.gmra.mrb[18].mxu1 %vm439_vm2, %v7205_v40 }
 0x133   : > { %5246 = vmatprep.mubr.msk.f32.mxu1 %vm439_vm2, %v7206_v41 }
 0x134   : > { %5447 = vmatmul.mubr.msk.f32.gmra.mrb[20].mxu0 %vm439_vm2, %v6327_v6 }
 0x135   : > { %5449 = vmatprep.mubr.msk.f32.mxu0 %vm439_vm2, %v6331_v8 }
 0x136   : > { %5247 = vmatmul.mubr.msk.f32.gmra.mrb[20].mxu1 %vm439_vm2, %v7209_v50 }
 0x137   : > { %5249 = vmatprep.mubr.msk.f32.mxu1 %vm439_vm2, %v7210_v53 }
 0x138   : > { %5450 = vmatmul.mubr.msk.f32.gmra.mrb[22].mxu0 %vm439_vm2, %v6343_v44 }
 0x139   : > { %5452 = vmatprep.mubr.msk.f32.mxu0 %vm439_vm2, %v6347_v34 }
 0x13a   : > { %5250 = vmatmul.mubr.msk.f32.gmra.mrb[22].mxu1 %vm439_vm2, %v7213_v56 }
 0x13b   : > { %5252 = vmatprep.mubr.msk.f32.mxu1 %vm439_vm2, %v7214_v57 }
 0x13c   : > { %5453 = vmatmul.mubr.msk.f32.gmra.mrb[24].mxu0 %vm439_vm2, %v6359_v26 }
 0x13d   : > { %5455 = vmatprep.mubr.msk.f32.mxu0 %vm439_vm2, %v6363_v25 }
 0x13e   : > { %5253 = vmatmul.mubr.msk.f32.gmra.mrb[24].mxu1 %vm439_vm2, %v7217_v18 }
 0x13f   : > { %5255 = vmatprep.mubr.msk.f32.mxu1 %vm439_vm2, %v7218_v48 }
 0x140   : > { %5456 = vmatmul.mubr.msk.f32.gmra.mrb[26].mxu0 %vm439_vm2, %v7203_v36 }
 0x141   : > { %5458 = vmatprep.mubr.msk.f32.mxu0 %vm439_vm2, %v7231_v63 }
 0x142   : > { %5256 = vmatmul.mubr.msk.f32.gmra.mrb[26].mxu1 %vm439_vm2, %v7221_v38 }
 0x143   : > { %5258 = vmatprep.mubr.msk.f32.mxu1 %vm439_vm2, %v7232_v3 }
 0x144   : > { %5459 = vmatmul.mubr.msk.f32.gmra.mrb[28].mxu0 %vm439_vm2, %v7233_v5 }
 0x145   : > { %5461 = vmatprep.mubr.msk.f32.mxu0 %vm439_vm2, %v3602_v2 }
 0x146   : > { %5259 = vmatmul.mubr.msk.f32.gmra.mrb[28].mxu1 %vm439_vm2, %v7234_v9 }
 0x147   : > { %5261 = vmatprep.mubr.msk.f32.mxu1 %vm439_vm2, %v6686_v54 }
 0x148   : > { %5462 = vmatmul.mubr.msk.f32.gmra.mrb[30].mxu0 %vm439_vm2, %v3603_v7 }
 0x14a   : > { %5262 = vmatmul.mubr.msk.f32.gmra.mrb[30].mxu1 %vm439_vm2, %v6694_v58 }
 0x1c1   : > { %v5168_v11 = vpop.f32.mrb[0].mxu1 }
 0x1c2   : > { %v1820_v12 = vpop.f32.mrb[1].mxu1 }
 0x1c5   : > { %v5171_v14 = vpop.f32.mrb[2].mxu1 }
 0x1c6   : > { %v1830_v15 = vpop.f32.mrb[3].mxu1 }
 0x1c9   : > { %v5174_v16 = vpop.f32.mrb[4].mxu1 }
 0x1ca   : > { %v1840_v17 = vpop.f32.mrb[5].mxu1 }
 0x1cd   : > { %v5177_v19 = vpop.f32.mrb[6].mxu1 }
 0x1ce   : > { %v1850_v20 = vpop.f32.mrb[7].mxu1 }
 0x1d1   : > { %v5180_v21 = vpop.f32.mrb[8].mxu1 }
 0x1d2   : > { %v1860_v22 = vpop.f32.mrb[9].mxu1 }
 0x1d5   : > { %v6836_v23 = vpop.f32.mrb[10].mxu1 }
 0x1d6   : > { %v6838_v24 = vpop.f32.mrb[11].mxu1 }
 0x1d9   : > { %v6840_v25 = vpop.f32.mrb[12].mxu1 }
 0x1da   : > { %v6842_v26 = vpop.f32.mrb[13].mxu1 }
 0x1dd   : > { %v6844_v27 = vpop.f32.mrb[14].mxu1 }
 0x1de   : > { %v6846_v28 = vpop.f32.mrb[15].mxu1 }
 0x1df   : > { %v5418_v29 = vpop.f32.mrb[0].mxu0 }
 0x1e0   : > { %v5466_v31 = vadd.f32 %v5418_v29, %v5168_v11  ;;  %v3771_v32 = vpop.f32.mrb[1].mxu0 }
 0x1e1   : > { %v5467_v34 = vadd.f32 %v3771_v32, %v1820_v12 }
 0x1e2   : > { %v3970_v37 = vadd.f32 %v5466_v31, %v6851_v30 }
 0x1e3   : > { %v6855_v43 = vadd.f32 %v5467_v34, %v6851_v30  ;;  %v5421_v47 = vpop.f32.mrb[2].mxu0 }
 0x1e4   : > { %v4034_v49 = vmin.f32 %v3970_v37, 0.0  ;;  %v5468_v51 = vadd.f32 %v5421_v47, %v5171_v14  ;;  %v3781_v52 = vpop.f32.mrb[3].mxu0  ;;  %vm4002_vm4 = vcmp.gt.f32.partialorder %v3970_v37, 0.0 }
 0x1e5   : > { %v4033_v60 = vmin.f32 %v6855_v43, 0.0  ;;  %v5469_v39 = vadd.f32 %v3781_v52, %v1830_v15  ;;  %vm4001_vm5 = vcmp.gt.f32.partialorder %v6855_v43, 0.0 }
 0x1e6   : > { %v4067_v61 = vmul.f32 1.442695, %v4034_v49  ;;  %v6859_v4 = vadd.f32 %v5468_v51, %v6851_v30 }
 0x1e7   : > { %v4065_v6 = vmul.f32 1.442695, %v4033_v60  ;;  %v6862_v8 = vadd.f32 %v5469_v39, %v6851_v30  ;;  %v5424_v10 = vpop.f32.mrb[4].mxu0 }
 0x1e8   : > { %5747 = vpow2.f32 %v4067_v61  ;;  %v4036_v35 = vmin.f32 %v6859_v4, 0.0  ;;  %v5470_v44 = vadd.f32 %v5424_v10, %v5174_v16  ;;  %v3791_v1 = vpop.f32.mrb[5].mxu0  ;;  %vm4004_vm6 = vcmp.gt.f32.partialorder %v6859_v4, 0.0 }
 0x1e9   : > { %5749 = vpow2.f32 %v4065_v6  ;;  %v4035_v59 = vmin.f32 %v6862_v8, 0.0  ;;  %v5471_v62 = vadd.f32 %v3791_v1, %v1840_v17  ;;  %vm4003_vm7 = vcmp.gt.f32.partialorder %v6862_v8, 0.0 }
 0x1ea   : > { %v4071_v33 = vmul.f32 1.442695, %v4036_v35  ;;  %v6867_v36 = vadd.f32 %v5470_v44, %v6851_v30 }
 0x1eb   : > { %v4069_v40 = vmul.f32 1.442695, %v4035_v59  ;;  %v6870_v41 = vadd.f32 %v5471_v62, %v6851_v30  ;;  %v5427_v50 = vpop.f32.mrb[6].mxu0 }
 0x1ec   : > { %5751 = vpow2.f32 %v4071_v33  ;;  %v4038_v53 = vmin.f32 %v6867_v36, 0.0  ;;  %v5472_v56 = vadd.f32 %v5427_v50, %v5177_v19  ;;  %v3801_v57 = vpop.f32.mrb[7].mxu0  ;;  %vm4006_vm8 = vcmp.gt.f32.partialorder %v6867_v36, 0.0 }
 0x1ed   : > { %5753 = vpow2.f32 %v4069_v40  ;;  %v4037_v18 = vmin.f32 %v6870_v41, 0.0  ;;  %v5473_v48 = vadd.f32 %v3801_v57, %v1850_v20  ;;  %vm4005_vm9 = vcmp.gt.f32.partialorder %v6870_v41, 0.0 }
 0x1ee   : > { %v4075_v38 = vmul.f32 1.442695, %v4038_v53  ;;  %v6875_v54 = vadd.f32 %v5472_v56, %v6851_v30 }
 0x1ef   : > { %v4073_v0 = vmul.f32 1.442695, %v4037_v18  ;;  %v6878_v58 = vadd.f32 %v5473_v48, %v6851_v30  ;;  %v5430_v13 = vpop.f32.mrb[8].mxu0 }
 0x1f0   : > { %5755 = vpow2.f32 %v4075_v38  ;;  %v4040_v46 = vmin.f32 %v6875_v54, 0.0  ;;  %v5474_v45 = vadd.f32 %v5430_v13, %v5180_v21  ;;  %v3811_v55 = vpop.f32.mrb[9].mxu0  ;;  %vm4008_vm10 = vcmp.gt.f32.partialorder %v6875_v54, 0.0 }
 0x1f1   : > { %5757 = vpow2.f32 %v4073_v0  ;;  %v4039_v42 = vmin.f32 %v6878_v58, 0.0  ;;  %v5475_v63 = vadd.f32 %v3811_v55, %v1860_v22  ;;  %vm4007_vm11 = vcmp.gt.f32.partialorder %v6878_v58, 0.0 }
 0x1f2   : > { %v5748_v2 = vpop.eup %5747  ;;  %v4079_v3 = vmul.f32 1.442695, %v4040_v46  ;;  %v6883_v5 = vadd.f32 %v5474_v45, %v6851_v30 }
 0x1f3   : > { %v5750_v7 = vpop.eup %5749  ;;  %v4678_v9 = vadd.f32 -1.0, %v5748_v2  ;;  %v4077_v11 = vmul.f32 1.442695, %v4039_v42  ;;  %v6892_v12 = vadd.f32 %v5475_v63, %v6851_v30  ;;  %v5433_v14 = vpop.f32.mrb[10].mxu0 }
 0x1f4   : > { %v4677_v15 = vadd.f32 -1.0, %v5750_v7  ;;  %5759 = vpow2.f32 %v4079_v3  ;;  %v4042_v16 = vmin.f32 %v6883_v5, 0.0  ;;  %v3821_v17 = vpop.f32.mrb[11].mxu0  ;;  %v5476_v31 = vadd.f32 %v5433_v14, %v6836_v23 }
 0x1f5   : > { %v4162_v19 = vsel %vm4002_vm4, %v3970_v37, %v4678_v9  ;;  %5761 = vpow2.f32 %v4077_v11  ;;  %v4041_v20 = vmin.f32 %v6892_v12, 0.0  ;;  %v5477_v32 = vadd.f32 %v3821_v17, %v6838_v24 }
 0x1f6   : > { %v5752_v21 = vpop.eup %5751  ;;  %4195 = vst.msk [vmem:[%s6889_s9 + $0x8] sm:$0xff] %vm4193_vm3, %v4162_v19  ;;  %v4161_v22 = vsel %vm4001_vm5, %v6855_v43, %v4677_v15  ;;  %v4083_v29 = vmul.f32 1.442695, %v4042_v16  ;;  %v6907_v43 = vadd.f32 %v5476_v31, %v6851_v30  ;;  %vm4010_vm12 = vcmp.gt.f32.partialorder %v6883_v5, 0.0 }
 0x1f7   : > { %v5754_v34 = vpop.eup %5753  ;;  %4194 = vst.msk [vmem:[%s6889_s9] sm:$0xff] %vm4193_vm3, %v4161_v22  ;;  %v4680_v37 = vadd.f32 -1.0, %v5752_v21  ;;  %v4081_v47 = vmul.f32 1.442695, %v4041_v20  ;;  %v5436_v49 = vpop.f32.mrb[12].mxu0  ;;  %v6910_v23 = vadd.f32 %v5477_v32, %v6851_v30  ;;  %vm4009_vm13 = vcmp.gt.f32.partialorder %v6892_v12, 0.0 }
 0x1f8   : > { %v4679_v51 = vadd.f32 -1.0, %v5754_v34  ;;  %5763 = vpow2.f32 %v4083_v29  ;;  %v3831_v24 = vpop.f32.mrb[13].mxu0  ;;  %v5478_v60 = vadd.f32 %v5436_v49, %v6840_v25  ;;  %v4044_v10 = vmin.f32 %v6907_v43, 0.0 }
 0x1f9   : > { %v4164_v52 = vsel %vm4004_vm6, %v6859_v4, %v4680_v37  ;;  %5765 = vpow2.f32 %v4081_v47  ;;  %v5479_v39 = vadd.f32 %v3831_v24, %v6842_v26  ;;  %v4043_v1 = vmin.f32 %v6910_v23, 0.0 }
 0x1fa   : > { %v5756_v61 = vpop.eup %5755  ;;  %4197 = vst.msk [vmem:[%s6889_s9 + $0x18] sm:$0xff] %vm4193_vm3, %v4164_v52  ;;  %v4163_v6 = vsel %vm4003_vm7, %v6862_v8, %v4679_v51  ;;  %v6923_v4 = vadd.f32 %v5478_v60, %v6851_v30  ;;  %v4087_v59 = vmul.f32 1.442695, %v4044_v10  ;;  %vm4012_vm14 = vcmp.gt.f32.partialorder %v6907_v43, 0.0 }
 0x1fb   : > { %v5758_v35 = vpop.eup %5757  ;;  %4196 = vst.msk [vmem:[%s6889_s9 + $0x10] sm:$0xff] %vm4193_vm3, %v4163_v6  ;;  %v4682_v44 = vadd.f32 -1.0, %v5756_v61  ;;  %v6926_v25 = vadd.f32 %v5479_v39, %v6851_v30  ;;  %v5439_v26 = vpop.f32.mrb[14].mxu0  ;;  %v4085_v50 = vmul.f32 1.442695, %v4043_v1  ;;  %vm4011_vm15 = vcmp.gt.f32.partialorder %v6910_v23, 0.0 }
 0x1fc   : > { %v4681_v8 = vadd.f32 -1.0, %v5758_v35  ;;  %v5480_v62 = vadd.f32 %v5439_v26, %v6844_v27  ;;  %v3841_v33 = vpop.f32.mrb[15].mxu0  ;;  %v4046_v53 = vmin.f32 %v6923_v4, 0.0  ;;  %5767 = vpow2.f32 %v4087_v59 }
 0x1fd   : > { %v4166_v40 = vsel %vm4006_vm8, %v6867_v36, %v4682_v44  ;;  %v4045_v18 = vmin.f32 %v6926_v25, 0.0  ;;  %5769 = vpow2.f32 %v4085_v50  ;;  %vm4014_vm0 = vcmp.gt.f32.partialorder %v6923_v4, 0.0 }
 0x1fe   : > { %v5760_v56 = vpop.eup %5759  ;;  %4199 = vst.msk [vmem:[%s6889_s9 + $0x28] sm:$0xff] %vm4193_vm3, %v4166_v40  ;;  %v4165_v57 = vsel %vm4005_vm9, %v6870_v41, %v4681_v8  ;;  %v4091_v36 = vmul.f32 1.442695, %v4046_v53  ;;  %v6940_v38 = vadd.f32 %v5480_v62, %v6851_v30  ;;  %v5481_v41 = vadd.f32 %v3841_v33, %v6846_v28 }
 0x1ff   : > { %v5762_v48 = vpop.eup %5761  ;;  %4198 = vst.msk [vmem:[%s6889_s9 + $0x20] sm:$0xff] %vm4193_vm3, %v4165_v57  ;;  %v4684_v27 = vadd.f32 -1.0, %v5760_v56  ;;  %v5442_v0 = vpop.f32.mrb[16].mxu0  ;;  %v4089_v46 = vmul.f32 1.442695, %v4045_v18  ;;  %vm4013_vm1 = vcmp.gt.f32.partialorder %v6926_v25, 0.0 }
 0x200   : > { %v4683_v13 = vadd.f32 -1.0, %v5762_v48  ;;  %v3851_v45 = vpop.f32.mrb[17].mxu0  ;;  %5771 = vpow2.f32 %v4091_v36  ;;  %v4048_v42 = vmin.f32 %v6940_v38, 0.0  ;;  %v6951_v7 = vadd.f32 %v5481_v41, %v6851_v30 }
 0x201   : > { %v4168_v55 = vsel %vm4008_vm10, %v6875_v54, %v4684_v27  ;;  %v5242_v63 = vpop.f32.mrb[16].mxu1  ;;  %5773 = vpow2.f32 %v4089_v46  ;;  %vm4016_vm2 = vcmp.gt.f32.partialorder %v6940_v38, 0.0 }
 0x202   : > { %v5764_v2 = vpop.eup %5763  ;;  %4201 = vst.msk [vmem:[%s6889_s9 + $0x38] sm:$0xff] %vm4193_vm3, %v4168_v55  ;;  %v4167_v3 = vsel %vm4007_vm11, %v6878_v58, %v4683_v13  ;;  %v5482_v9 = vadd.f32 %v5442_v0, %v5242_v63  ;;  %v2290_v28 = vpop.f32.mrb[17].mxu1  ;;  %v4095_v14 = vmul.f32 1.442695, %v4048_v42  ;;  %v4047_v58 = vmin.f32 %v6951_v7, 0.0 }
 0x203   : > { %v5766_v11 = vpop.eup %5765  ;;  %4200 = vst.msk [vmem:[%s6889_s9 + $0x30] sm:$0xff] %vm4193_vm3, %v4167_v3  ;;  %v4686_v54 = vadd.f32 -1.0, %v5764_v2  ;;  %v5483_v15 = vadd.f32 %v3851_v45, %v2290_v28  ;;  %v5445_v16 = vpop.f32.mrb[18].mxu0  ;;  %vm4015_vm4 = vcmp.gt.f32.partialorder %v6951_v7, 0.0 }
 0x204   : > { %v4685_v17 = vadd.f32 -1.0, %v5766_v11  ;;  %v6958_v19 = vadd.f32 %v5482_v9, %v6851_v30  ;;  %v3861_v20 = vpop.f32.mrb[19].mxu0  ;;  %5775 = vpow2.f32 %v4095_v14  ;;  %v4093_v32 = vmul.f32 1.442695, %v4047_v58 }
 0x205   : > { %v4170_v21 = vsel %vm4010_vm12, %v6883_v5, %v4686_v54  ;;  %v6963_v22 = vadd.f32 %v5483_v15, %v6851_v30  ;;  %v5245_v29 = vpop.f32.mrb[18].mxu1 }
 0x206   : > { %4203 = vst.msk [vmem:[%s6889_s9 + $0x48] sm:$0xff] %vm4193_vm3, %v4170_v21  ;;  %v4169_v31 = vsel %vm4009_vm13, %v6892_v12, %v4685_v17  ;;  %v4050_v34 = vmin.f32 %v6958_v19, 0.0  ;;  %v2300_v37 = vpop.f32.mrb[19].mxu1  ;;  %v5484_v5 = vadd.f32 %v5445_v16, %v5245_v29  ;;  %v5768_v24 = vpop.eup %5767  ;;  %5777 = vpow2.f32 %v4093_v32 }
 0x207   : > { %4202 = vst.msk [vmem:[%s6889_s9 + $0x40] sm:$0xff] %vm4193_vm3, %v4169_v31  ;;  %v4049_v47 = vmin.f32 %v6963_v22, 0.0  ;;  %v5485_v49 = vadd.f32 %v3861_v20, %v2300_v37  ;;  %v5448_v51 = vpop.f32.mrb[20].mxu0  ;;  %v5770_v39 = vpop.eup %5769  ;;  %v4688_v61 = vadd.f32 -1.0, %v5768_v24  ;;  %vm4018_vm5 = vcmp.gt.f32.partialorder %v6958_v19, 0.0 }
 0x208   : > { %v4099_v52 = vmul.f32 1.442695, %v4050_v34  ;;  %v3871_v60 = vpop.f32.mrb[21].mxu0  ;;  %v6973_v12 = vadd.f32 %v5484_v5, %v6851_v30  ;;  %v4687_v44 = vadd.f32 -1.0, %v5770_v39  ;;  %vm4017_vm6 = vcmp.gt.f32.partialorder %v6963_v22, 0.0 }
 0x209   : > { %v4097_v6 = vmul.f32 1.442695, %v4049_v47  ;;  %v6976_v10 = vadd.f32 %v5485_v49, %v6851_v30  ;;  %v5248_v35 = vpop.f32.mrb[20].mxu1  ;;  %v4172_v59 = vsel %vm4012_vm14, %v6907_v43, %v4688_v61 }
 0x20a   : > { %5779 = vpow2.f32 %v4099_v52  ;;  %v5486_v1 = vadd.f32 %v5448_v51, %v5248_v35  ;;  %v2310_v26 = vpop.f32.mrb[21].mxu1  ;;  %v5772_v8 = vpop.eup %5771  ;;  %v4052_v62 = vmin.f32 %v6973_v12, 0.0  ;;  %4205 = vst.msk [vmem:[%s6889_s9 + $0x58] sm:$0xff] %vm4193_vm3, %v4172_v59  ;;  %v4171_v50 = vsel %vm4011_vm15, %v6910_v23, %v4687_v44 }
 0x20b   : > { %5781 = vpow2.f32 %v4097_v6  ;;  %v5451_v33 = vpop.f32.mrb[22].mxu0  ;;  %v5774_v40 = vpop.eup %5773  ;;  %v4690_v53 = vadd.f32 -1.0, %v5772_v8  ;;  %v4051_v56 = vmin.f32 %v6976_v10, 0.0  ;;  %4204 = vst.msk [vmem:[%s6889_s9 + $0x50] sm:$0xff] %vm4193_vm3, %v4171_v50  ;;  %v5487_v27 = vadd.f32 %v3871_v60, %v2310_v26 }
 0x20c   : > { %v3881_v57 = vpop.f32.mrb[23].mxu0  ;;  %v4689_v43 = vadd.f32 -1.0, %v5774_v40  ;;  %v4103_v18 = vmul.f32 1.442695, %v4052_v62  ;;  %v6990_v48 = vadd.f32 %v5486_v1, %v6851_v30  ;;  %vm4020_vm7 = vcmp.gt.f32.partialorder %v6973_v12, 0.0 }
 0x20d   : > { %v5251_v36 = vpop.f32.mrb[22].mxu1  ;;  %v4174_v0 = vsel %vm4014_vm0, %v6923_v4, %v4690_v53  ;;  %v4101_v23 = vmul.f32 1.442695, %v4051_v56  ;;  %v7001_v4 = vadd.f32 %v5487_v27, %v6851_v30  ;;  %vm4019_vm8 = vcmp.gt.f32.partialorder %v6976_v10, 0.0 }
 0x20e   : > { %v5488_v13 = vadd.f32 %v5451_v33, %v5251_v36  ;;  %v2320_v46 = vpop.f32.mrb[23].mxu1  ;;  %v5776_v41 = vpop.eup %5775  ;;  %4207 = vst.msk [vmem:[%s6889_s9 + $0x68] sm:$0xff] %vm4193_vm3, %v4174_v0  ;;  %v4173_v45 = vsel %vm4013_vm1, %v6926_v25, %v4689_v43  ;;  %5783 = vpow2.f32 %v4103_v18  ;;  %v4054_v55 = vmin.f32 %v6990_v48, 0.0 }
 0x20f   : > { %v5454_v42 = vpop.f32.mrb[24].mxu0  ;;  %4206 = vst.msk [vmem:[%s6889_s9 + $0x60] sm:$0xff] %vm4193_vm3, %v4173_v45  ;;  %v4692_v63 = vadd.f32 -1.0, %v5776_v41  ;;  %5785 = vpow2.f32 %v4101_v23  ;;  %v5489_v25 = vadd.f32 %v3881_v57, %v2320_v46  ;;  %v4053_v14 = vmin.f32 %v7001_v4, 0.0 }
 0x210   : > { %v7004_v2 = vadd.f32 %v5488_v13, %v6851_v30  ;;  %v3891_v3 = vpop.f32.mrb[25].mxu0  ;;  %v4107_v9 = vmul.f32 1.442695, %v4054_v55  ;;  %v5778_v11 = vpop.eup %5777  ;;  %vm4022_vm9 = vcmp.gt.f32.partialorder %v6990_v48, 0.0  ;;  %vm4021_vm10 = vcmp.gt.f32.partialorder %v7001_v4, 0.0 }
 0x211   : > { %v5254_v28 = vpop.f32.mrb[24].mxu1  ;;  %v4176_v54 = vsel %vm4016_vm2, %v6940_v38, %v4692_v63  ;;  %v4691_v16 = vadd.f32 -1.0, %v5778_v11  ;;  %v7014_v58 = vadd.f32 %v5489_v25, %v6851_v30  ;;  %v4105_v38 = vmul.f32 1.442695, %v4053_v14 }
 0x212   : > { %v2330_v15 = vpop.f32.mrb[25].mxu1  ;;  %4209 = vst.msk [vmem:[%s6889_s9 + $0x78] sm:$0xff] %vm4193_vm3, %v4176_v54  ;;  %5787 = vpow2.f32 %v4107_v9  ;;  %v4056_v17 = vmin.f32 %v7004_v2, 0.0  ;;  %v5490_v29 = vadd.f32 %v5454_v42, %v5254_v28  ;;  %vm4024_vm11 = vcmp.gt.f32.partialorder %v7004_v2, 0.0 }
 0x213   : > { %v5457_v20 = vpop.f32.mrb[26].mxu0  ;;  %v5491_v31 = vadd.f32 %v3891_v3, %v2330_v15  ;;  %v4175_v37 = vsel %vm4015_vm4, %v6951_v7, %v4691_v16  ;;  %5789 = vpow2.f32 %v4105_v38  ;;  %v4055_v24 = vmin.f32 %v7014_v58, 0.0 }
 0x214   : > { %v5780_v21 = vpop.eup %5779  ;;  %v3901_v32 = vpop.f32.mrb[27].mxu0  ;;  %v4111_v5 = vmul.f32 1.442695, %v4056_v17  ;;  %4208 = vst.msk [vmem:[%s6889_s9 + $0x70] sm:$0xff] %vm4193_vm3, %v4175_v37  ;;  %v7025_v52 = vadd.f32 %v5490_v29, %v6851_v30  ;;  %vm4023_vm12 = vcmp.gt.f32.partialorder %v7014_v58, 0.0 }
 0x215   : > { %v5782_v34 = vpop.eup %5781  ;;  %v4694_v47 = vadd.f32 -1.0, %v5780_v21  ;;  %v5257_v49 = vpop.f32.mrb[26].mxu1  ;;  %v7031_v39 = vadd.f32 %v5491_v31, %v6851_v30  ;;  %v4109_v44 = vmul.f32 1.442695, %v4055_v24 }
 0x216   : > { %v4693_v51 = vadd.f32 -1.0, %v5782_v34  ;;  %v2340_v60 = vpop.f32.mrb[27].mxu1  ;;  %5791 = vpow2.f32 %v4111_v5  ;;  %v5492_v61 = vadd.f32 %v5457_v20, %v5257_v49  ;;  %v4058_v1 = vmin.f32 %v7025_v52, 0.0 }
 0x217   : > { %v4178_v7 = vsel %vm4018_vm5, %v6958_v19, %v4694_v47  ;;  %v5460_v6 = vpop.f32.mrb[28].mxu0  ;;  %v4057_v19 = vmin.f32 %v7031_v39, 0.0  ;;  %v5493_v62 = vadd.f32 %v3901_v32, %v2340_v60  ;;  %5793 = vpow2.f32 %v4109_v44 }
 0x218   : > { %4211 = vst.msk [vmem:[%s6889_s9 + $0x88] sm:$0xff] %vm4193_vm3, %v4178_v7  ;;  %v4177_v35 = vsel %vm4017_vm6, %v6963_v22, %v4693_v51  ;;  %v3911_v26 = vpop.f32.mrb[29].mxu0  ;;  %v5784_v8 = vpop.eup %5783  ;;  %v7042_v59 = vadd.f32 %v5492_v61, %v6851_v30  ;;  %v4115_v22 = vmul.f32 1.442695, %v4058_v1  ;;  %vm4026_vm13 = vcmp.gt.f32.partialorder %v7025_v52, 0.0 }
 0x219   : > { %4210 = vst.msk [vmem:[%s6889_s9 + $0x80] sm:$0xff] %vm4193_vm3, %v4177_v35  ;;  %v5260_v33 = vpop.f32.mrb[28].mxu1  ;;  %v5786_v40 = vpop.eup %5785  ;;  %v4696_v50 = vadd.f32 -1.0, %v5784_v8  ;;  %v4113_v43 = vmul.f32 1.442695, %v4057_v19  ;;  %v7050_v0 = vadd.f32 %v5493_v62, %v6851_v30  ;;  %vm4025_vm14 = vcmp.gt.f32.partialorder %v7031_v39, 0.0 }
 0x21a   : > { %v5494_v53 = vadd.f32 %v5460_v6, %v5260_v33  ;;  %v2350_v56 = vpop.f32.mrb[29].mxu1  ;;  %v4695_v57 = vadd.f32 -1.0, %v5786_v40  ;;  %v4060_v18 = vmin.f32 %v7042_v59, 0.0  ;;  %5795 = vpow2.f32 %v4115_v22 }
 0x21b   : > { %v5463_v27 = vpop.f32.mrb[30].mxu0  ;;  %v4180_v36 = vsel %vm4020_vm7, %v6973_v12, %v4696_v50  ;;  %5797 = vpow2.f32 %v4113_v43  ;;  %v5495_v55 = vadd.f32 %v3911_v26, %v2350_v56  ;;  %v4059_v63 = vmin.f32 %v7050_v0, 0.0 }
 0x21c   : > { %v7053_v23 = vadd.f32 %v5494_v53, %v6851_v30  ;;  %v3921_v13 = vpop.f32.mrb[31].mxu0  ;;  %v5788_v46 = vpop.eup %5787  ;;  %4213 = vst.msk [vmem:[%s6889_s9 + $0x98] sm:$0xff] %vm4193_vm3, %v4180_v36  ;;  %v4179_v41 = vsel %vm4019_vm8, %v6976_v10, %v4695_v57  ;;  %v4119_v45 = vmul.f32 1.442695, %v4060_v18  ;;  %vm4028_vm15 = vcmp.gt.f32.partialorder %v7042_v59, 0.0 }
 0x21d   : > { %v5263_v42 = vpop.f32.mrb[30].mxu1  ;;  %4212 = vst.msk [vmem:[%s6889_s9 + $0x90] sm:$0xff] %vm4193_vm3, %v4179_v41  ;;  %v4698_v12 = vadd.f32 -1.0, %v5788_v46  ;;  %v7064_v25 = vadd.f32 %v5495_v55, %v6851_v30  ;;  %v5790_v28 = vpop.eup %5789  ;;  %v4117_v54 = vmul.f32 1.442695, %v4059_v63  ;;  %vm4027_vm0 = vcmp.gt.f32.partialorder %v7050_v0, 0.0 }
 0x21e   : > { %v2360_v3 = vpop.f32.mrb[31].mxu1  ;;  %5799 = vpow2.f32 %v4119_v45  ;;  %v4062_v9 = vmin.f32 %v7053_v23, 0.0  ;;  %v5496_v10 = vadd.f32 %v5463_v27, %v5263_v42  ;;  %v4697_v16 = vadd.f32 -1.0, %v5790_v28 }
 0x21f   : > { %v4182_v11 = vsel %vm4022_vm9, %v6990_v48, %v4698_v12  ;;  %v5497_v14 = vadd.f32 %v3921_v13, %v2360_v3  ;;  %v4061_v20 = vmin.f32 %v7064_v25, 0.0  ;;  %5801 = vpow2.f32 %v4117_v54 }
 0x220   : > { %v5792_v15 = vpop.eup %5791  ;;  %4215 = vst.msk [vmem:[%s6889_s9 + $0xa8] sm:$0xff] %vm4193_vm3, %v4182_v11  ;;  %v4123_v17 = vmul.f32 1.442695, %v4062_v9  ;;  %v4000_v38 = vadd.f32 %v5496_v10, %v6851_v30  ;;  %v4181_v48 = vsel %vm4021_vm10, %v7001_v4, %v4697_v16  ;;  %vm4030_vm1 = vcmp.gt.f32.partialorder %v7053_v23, 0.0 }
 0x221   : > { %v4700_v21 = vadd.f32 -1.0, %v5792_v15  ;;  %v3999_v29 = vadd.f32 %v5497_v14, %v6851_v30  ;;  %v4121_v31 = vmul.f32 1.442695, %v4061_v20  ;;  %v5794_v32 = vpop.eup %5793  ;;  %4214 = vst.msk [vmem:[%s6889_s9 + $0xa0] sm:$0xff] %vm4193_vm3, %v4181_v48  ;;  %vm4029_vm2 = vcmp.gt.f32.partialorder %v7064_v25, 0.0 }
 0x222   : > { %5803 = vpow2.f32 %v4123_v17  ;;  %v4064_v37 = vmin.f32 %v4000_v38, 0.0  ;;  %v4699_v47 = vadd.f32 -1.0, %v5794_v32  ;;  %vm4032_vm4 = vcmp.gt.f32.partialorder %v4000_v38, 0.0 }
 0x223   : > { %v4184_v34 = vsel %vm4024_vm11, %v7004_v2, %v4700_v21  ;;  %5805 = vpow2.f32 %v4121_v31  ;;  %v4063_v5 = vmin.f32 %v3999_v29, 0.0  ;;  %vm4031_vm5 = vcmp.gt.f32.partialorder %v3999_v29, 0.0 }
 0x224   : > { %4217 = vst.msk [vmem:[%s6889_s9 + $0xb8] sm:$0xff] %vm4193_vm3, %v4184_v34  ;;  %v5796_v30 = vpop.eup %5795  ;;  %v4127_v4 = vmul.f32 1.442695, %v4064_v37  ;;  %v4183_v51 = vsel %vm4023_vm12, %v7014_v58, %v4699_v47 }
 0x225   : > { %v5798_v49 = vpop.eup %5797  ;;  %v4702_v24 = vadd.f32 -1.0, %v5796_v30  ;;  %v4125_v60 = vmul.f32 1.442695, %v4063_v5  ;;  %4216 = vst.msk [vmem:[%s6889_s9 + $0xb0] sm:$0xff] %vm4193_vm3, %v4183_v51 }
 0x226   : > { %v4701_v2 = vadd.f32 -1.0, %v5798_v49  ;;  %5807 = vpow2.f32 %v4127_v4 }
 0x227   : > { %v4186_v61 = vsel %vm4026_vm13, %v7025_v52, %v4702_v24  ;;  %5809 = vpow2.f32 %v4125_v60 }
 0x228   : > { %v5800_v7 = vpop.eup %5799  ;;  %4219 = vst.msk [vmem:[%s6889_s9 + $0xc8] sm:$0xff] %vm4193_vm3, %v4186_v61  ;;  %v4185_v58 = vsel %vm4025_vm14, %v7031_v39, %v4701_v2 }
 0x229   : > { %v4704_v6 = vadd.f32 -1.0, %v5800_v7  ;;  %4218 = vst.msk [vmem:[%s6889_s9 + $0xc0] sm:$0xff] %vm4193_vm3, %v4185_v58  ;;  %v5802_v35 = vpop.eup %5801 }
 0x22a   : > { %v4703_v52 = vadd.f32 -1.0, %v5802_v35 }
 0x22b   : > { %v4188_v44 = vsel %vm4028_vm15, %v7042_v59, %v4704_v6 }
 0x22c   : > { %v5804_v1 = vpop.eup %5803  ;;  %4221 = vst.msk [vmem:[%s6889_s9 + $0xd8] sm:$0xff] %vm4193_vm3, %v4188_v44  ;;  %v4187_v39 = vsel %vm4027_vm0, %v7050_v0, %v4703_v52 }
 0x22d   : > { %v4706_v26 = vadd.f32 -1.0, %v5804_v1  ;;  %v5806_v8 = vpop.eup %5805  ;;  %4220 = vst.msk [vmem:[%s6889_s9 + $0xd0] sm:$0xff] %vm4193_vm3, %v4187_v39 }
 0x22e   : > { %v4705_v59 = vadd.f32 -1.0, %v5806_v8 }
 0x22f   : > { %v4190_v19 = vsel %vm4030_vm1, %v7053_v23, %v4706_v26 }
 0x230   : > { %4223 = vst.msk [vmem:[%s6889_s9 + $0xe8] sm:$0xff] %vm4193_vm3, %v4190_v19  ;;  %v5808_v62 = vpop.eup %5807  ;;  %v4189_v33 = vsel %vm4029_vm2, %v7064_v25, %v4705_v59 }
 0x231   : > { %v5810_v40 = vpop.eup %5809  ;;  %4222 = vst.msk [vmem:[%s6889_s9 + $0xe0] sm:$0xff] %vm4193_vm3, %v4189_v33  ;;  %v4708_v50 = vadd.f32 -1.0, %v5808_v62 }
 0x232   : > { %v4707_v22 = vadd.f32 -1.0, %v5810_v40 }
 0x233   : > { %v4192_v53 = vsel %vm4032_vm4, %v4000_v38, %v4708_v50 }
 0x234   : > { %4225 = vst.msk [vmem:[%s6889_s9 + $0xf8] sm:$0xff] %vm4193_vm3, %v4192_v53  ;;  %v4191_v56 = vsel %vm4031_vm5, %v3999_v29, %v4707_v22 }
 0x235   : > { %4224 = vst.msk [vmem:[%s6889_s9 + $0xf0] sm:$0xff] %vm4193_vm3, %v4191_v56 }
 0x236 PF: > { %s15_s20 = sadd.s32 1, %s5833_s20   ;;  %s7235_s18 = smov %s5829_s19 }
 0x237   : > { %p12_p5 = scmp.ge.s32.totalorder %s15_s20, 4   ;;  %s7236_s19 = smov %s7238_s21 }
 0x239   :  { %14 = sbr.rel (!%p12_p5) target bundleno = 2 (0x2), region = 87 }

</bundles_post_ra>
